<compile_context>
chip_gen: v7x
topology: tpu7x:2x2x1
jax: 0.10.0
libtpu: 0.0.40
codegen_flags: <defaults>
</compile_context>

<pallas_src>
import jax
import jax.numpy as jnp
import numpy as np
from jax.experimental import pallas as pl
from jax.experimental.pallas import tpu as pltpu


# ----------------------------------------------------------------------------
# Kernel: one row-tile of the flattened activation per grid step.
#   z_ref   : (TM, e_dim)   activation rows
#   emb_ref : (n_e, e_dim)  codebook E
#   embt_ref: (e_dim, n_e)  E^T            (precomputed host-side)
#   esq_ref : (1, n_e)      ||e_k||^2      (precomputed host-side)
# Outputs:
#   zq_ref  : (TM, e_dim)   quantized rows
#   idx_ref : (TM, 1) int32 nearest-code indices
#   sq_ref  : (TM, 1) f32   sum_j (z_q - z)^2 per row  (loss partials)
# ----------------------------------------------------------------------------
def _vq_kernel(z_ref, emb_ref, embt_ref, esq_ref, zq_ref, idx_ref, sq_ref):
    z = z_ref[...]                                                  # (TM, e_dim)
    n_e = emb_ref.shape[0]

    # distances up to the per-row constant ||z||^2 :  ||e||^2 - 2 z E^T
    scores = jnp.dot(z, embt_ref[...], preferred_element_type=jnp.float32)  # (TM, n_e)
    d = esq_ref[...] - 2.0 * scores                                 # (TM, n_e)

    # argmin with first-occurrence tie-break (matches torch/jnp argmin)
    d_min = jnp.min(d, axis=1, keepdims=True)                       # (TM, 1)
    col = jax.lax.broadcasted_iota(jnp.int32, d.shape, 1)           # (TM, n_e)
    idx = jnp.min(jnp.where(d == d_min, col, n_e), axis=1, keepdims=True)  # (TM, 1)

    # exact codebook lookup as a one-hot matmul on the MXU
    onehot = (col == idx).astype(jnp.float32)                       # (TM, n_e)
    zq = jnp.dot(onehot, emb_ref[...], preferred_element_type=jnp.float32)  # (TM, e_dim)

    zq_ref[...] = zq
    idx_ref[...] = idx
    diff = zq - z
    sq_ref[...] = jnp.sum(diff * diff, axis=1, keepdims=True)       # (TM, 1)


# ----------------------------------------------------------------------------
# Wrapper
# ----------------------------------------------------------------------------
def vector_quantize(z, embedding, beta, *, tile_m=128):
    """z: (..., e_dim) f32; embedding: (n_e, e_dim) f32.

    Returns (z_q, min_encoding_indices, loss) with the same forward values as
    the PyTorch VectorQuantizer.forward.
    """
    n_e, e_dim = embedding.shape
    assert z.shape[-1] == e_dim
    orig_shape = z.shape

    zf = z.reshape(-1, e_dim).astype(jnp.float32)
    M = zf.shape[0]
    G = pl.cdiv(M, tile_m)
    Mp = G * tile_m
    if Mp != M:
        zf = jnp.pad(zf, ((0, Mp - M), (0, 0)))

    emb = embedding.astype(jnp.float32)
    emb_t = emb.T                                            # (e_dim, n_e), host-side
    e_sq = jnp.sum(emb * emb, axis=1, keepdims=True).T       # (1, n_e),   host-side

    zq_p, idx_p, sq_p = pl.pallas_call(
        _vq_kernel,
        out_shape=(
            jax.ShapeDtypeStruct((Mp, e_dim), jnp.float32),
            jax.ShapeDtypeStruct((Mp, 1), jnp.int32),
            jax.ShapeDtypeStruct((Mp, 1), jnp.float32),
        ),
        grid=(G,),
        in_specs=[
            pl.BlockSpec((tile_m, e_dim), lambda i: (i, 0)),
            pl.BlockSpec((n_e, e_dim), lambda i: (0, 0)),
            pl.BlockSpec((e_dim, n_e), lambda i: (0, 0)),
            pl.BlockSpec((1, n_e), lambda i: (0, 0)),
        ],
        out_specs=[
            pl.BlockSpec((tile_m, e_dim), lambda i: (i, 0)),
            pl.BlockSpec((tile_m, 1), lambda i: (i, 0)),
            pl.BlockSpec((tile_m, 1), lambda i: (i, 0)),
        ],
        compiler_params=pltpu.CompilerParams(dimension_semantics=("parallel",)),
    )(zf, emb, emb_t, e_sq)

    z_q = zq_p[:M].reshape(orig_shape)
    indices = idx_p[:M, 0]
    mean_sq = jnp.sum(sq_p[:M]) / (M * e_dim)
    # loss = mean((zq.detach()-z)^2) + beta*mean((zq-z.detach())^2); same forward value
    loss = mean_sq + beta * mean_sq
    return z_q, indices, loss


# ----------------------------------------------------------------------------
# Pure-JAX reference (faithful to the PyTorch forward) for verification
# ----------------------------------------------------------------------------
def _vq_ref(z, emb, beta):
    e_dim = emb.shape[1]
    zf = z.reshape(-1, e_dim)
    d = (jnp.sum(zf ** 2, axis=1, keepdims=True)
         + jnp.sum(emb ** 2, axis=1)
         - 2.0 * zf @ emb.T)
    idx = jnp.argmin(d, axis=1)
    zq = emb[idx].reshape(z.shape)
    sq = jnp.mean((zq - z) ** 2)
    loss = sq + beta * sq
    return zq, idx, loss


if __name__ == "__main__":
    n_e, e_dim, beta = 256, 128, 0.25
    N, H, W = 2, 16, 16                       # z: (N, H, W, e_dim) -> 512 vectors

    key = jax.random.PRNGKey(0)
    k_emb, k_z = jax.random.split(key)
    # torch init: uniform(-1/n_e, 1/n_e)
    embedding = jax.random.uniform(k_emb, (n_e, e_dim), jnp.float32,
                                   minval=-1.0 / n_e, maxval=1.0 / n_e)
    z = jax.random.normal(k_z, (N, H, W, e_dim), jnp.float32)

    z_q, indices, loss = vector_quantize(z, embedding, beta)
    jax.block_until_ready((z_q, indices, loss))

    assert z_q.shape == z.shape, z_q.shape
    assert indices.shape == (N * H * W,), indices.shape

    zq_ref, idx_ref, loss_ref = _vq_ref(z, embedding, beta)
    np.testing.assert_array_equal(np.asarray(indices), np.asarray(idx_ref))
    np.testing.assert_allclose(np.asarray(z_q), np.asarray(zq_ref),
                               rtol=1e-5, atol=1e-6)
    np.testing.assert_allclose(float(loss), float(loss_ref), rtol=1e-5, atol=1e-6)

    # TODO(synk): .detach() / straight-through estimator only alter gradients;
    # forward values are reproduced exactly here (no backward pass implemented).

    print("KERNEL_OK")
</pallas_src>

<mosaic_0001>
module attributes {stable_mosaic.version = 11 : i64} {
  func.func @_vq_kernel(%arg0: i32, %arg1: memref<128x128xf32, #tpu.memory_space<vmem>>, %arg2: memref<256x128xf32, #tpu.memory_space<vmem>>, %arg3: memref<128x256xf32, #tpu.memory_space<vmem>>, %arg4: memref<1x256xf32, #tpu.memory_space<vmem>>, %arg5: memref<128x128xf32, #tpu.memory_space<vmem>>, %arg6: memref<128x1xi32, #tpu.memory_space<vmem>>, %arg7: memref<128x1xf32, #tpu.memory_space<vmem>>) attributes {dimension_semantics = [#tpu.dimension_semantics<parallel>], iteration_bounds = array<i64: 4>, scalar_prefetch = 0 : i64, scratch_operands = 0 : i64, tpu.core_type = #tpu.core_type<tc>, window_params = [{transform_indices = @transform_0, window_bounds = array<i64: 128, 128>}, {pipeline_mode = #tpu.pipeline_mode<synchronous>, transform_indices = @transform_1, window_bounds = array<i64: 256, 128>}, {pipeline_mode = #tpu.pipeline_mode<synchronous>, transform_indices = @transform_2, window_bounds = array<i64: 128, 256>}, {pipeline_mode = #tpu.pipeline_mode<synchronous>, transform_indices = @transform_3, window_bounds = array<i64: 1, 256>}, {transform_indices = @transform_4, window_bounds = array<i64: 128, 128>}, {transform_indices = @transform_5, window_bounds = array<i64: 128, 1>}, {transform_indices = @transform_6, window_bounds = array<i64: 128, 1>}]} {
    %c0 = arith.constant 0 : index
    %c0_0 = arith.constant 0 : index
    %0 = vector.load %arg1[%c0, %c0_0] : memref<128x128xf32, #tpu.memory_space<vmem>>, vector<128x128xf32>
    %c0_1 = arith.constant 0 : index
    %c0_2 = arith.constant 0 : index
    %1 = vector.load %arg3[%c0_1, %c0_2] : memref<128x256xf32, #tpu.memory_space<vmem>>, vector<128x256xf32>
    %cst = arith.constant dense<0.000000e+00> : vector<128x256xf32>
    %2 = tpu.matmul %0, %1, %cst {dimension_numbers = #tpu.dot_dimension_numbers<[1], [0], [0], [1], [0, 0, 1, 1], [], []>} : vector<128x128xf32>, vector<128x256xf32>, vector<128x256xf32> -> vector<128x256xf32>
    %c0_3 = arith.constant 0 : index
    %c0_4 = arith.constant 0 : index
    %3 = vector.load %arg4[%c0_3, %c0_4] : memref<1x256xf32, #tpu.memory_space<vmem>>, vector<1x256xf32>
    %cst_5 = arith.constant 2.000000e+00 : f32
    %4 = vector.broadcast %cst_5 : f32 to vector<128x256xf32>
    %5 = arith.mulf %4, %2 : vector<128x256xf32>
    %6 = vector.broadcast %3 : vector<1x256xf32> to vector<128x256xf32>
    %7 = arith.subf %6, %5 : vector<128x256xf32>
    %cst_6 = arith.constant dense<0x7F800000> : vector<128xf32>
    %8 = vector.multi_reduction <minimumf>, %7, %cst_6 [1] : vector<128x256xf32> to vector<128xf32>
    %9 = vector.shape_cast %8 : vector<128xf32> to vector<128x1xf32>
    %10 = tpu.iota {dimensions = array<i32: 1>} : vector<128x256xi32>
    %11 = vector.broadcast %9 : vector<128x1xf32> to vector<128x256xf32>
    %12 = arith.cmpf oeq, %7, %11 : vector<128x256xf32>
    %c256_i32 = arith.constant 256 : i32
    %13 = vector.broadcast %c256_i32 : i32 to vector<128x256xi32>
    %14 = arith.select %12, %10, %13 : vector<128x256xi1>, vector<128x256xi32>
    %cst_7 = arith.constant dense<2147483647> : vector<128xi32>
    %15 = vector.multi_reduction <minsi>, %14, %cst_7 [1] : vector<128x256xi32> to vector<128xi32>
    %16 = vector.shape_cast %15 : vector<128xi32> to vector<128x1xi32>
    %17 = vector.broadcast %16 : vector<128x1xi32> to vector<128x256xi32>
    %18 = arith.cmpi eq, %10, %17 : vector<128x256xi32>
    %19 = arith.extui %18 : vector<128x256xi1> to vector<128x256xi32>
    %20 = arith.sitofp %19 : vector<128x256xi32> to vector<128x256xf32>
    %c0_8 = arith.constant 0 : index
    %c0_9 = arith.constant 0 : index
    %21 = vector.load %arg2[%c0_8, %c0_9] : memref<256x128xf32, #tpu.memory_space<vmem>>, vector<256x128xf32>
    %cst_10 = arith.constant dense<0.000000e+00> : vector<128x128xf32>
    %22 = tpu.matmul %20, %21, %cst_10 {dimension_numbers = #tpu.dot_dimension_numbers<[1], [0], [0], [1], [0, 0, 1, 1], [], []>} : vector<128x256xf32>, vector<256x128xf32>, vector<128x128xf32> -> vector<128x128xf32>
    %c0_11 = arith.constant 0 : index
    %c0_12 = arith.constant 0 : index
    %23 = vector.load %arg5[%c0_11, %c0_12] : memref<128x128xf32, #tpu.memory_space<vmem>>, vector<128x128xf32>
    tpu.vector_store %arg5[%c0_11, %c0_12], %22 {strides = array<i32>} : memref<128x128xf32, #tpu.memory_space<vmem>>, vector<128x128xf32>,
    %c0_13 = arith.constant 0 : index
    %c0_14 = arith.constant 0 : index
    %24 = vector.load %arg6[%c0_13, %c0_14] : memref<128x1xi32, #tpu.memory_space<vmem>>, vector<128x1xi32>
    tpu.vector_store %arg6[%c0_13, %c0_14], %16 {strides = array<i32>} : memref<128x1xi32, #tpu.memory_space<vmem>>, vector<128x1xi32>,
    %25 = arith.subf %22, %0 : vector<128x128xf32>
    %26 = arith.mulf %25, %25 : vector<128x128xf32>
    %cst_15 = arith.constant dense<0.000000e+00> : vector<128xf32>
    %27 = vector.multi_reduction <add>, %26, %cst_15 [1] : vector<128x128xf32> to vector<128xf32>
    %28 = vector.shape_cast %27 : vector<128xf32> to vector<128x1xf32>
    %c0_16 = arith.constant 0 : index
    %c0_17 = arith.constant 0 : index
    %29 = vector.load %arg7[%c0_16, %c0_17] : memref<128x1xf32, #tpu.memory_space<vmem>>, vector<128x1xf32>
    tpu.vector_store %arg7[%c0_16, %c0_17], %28 {strides = array<i32>} : memref<128x1xf32, #tpu.memory_space<vmem>>, vector<128x1xf32>,
    return
  }
  func.func @transform_0(%arg0: i32) -> (i32, i32) {
    %c0_i32 = arith.constant 0 : i32
    %c0_i32_0 = arith.constant 0 : i32
    return %arg0, %c0_i32 : i32, i32
  }
  func.func @transform_1(%arg0: i32) -> (i32, i32) {
    %c0_i32 = arith.constant 0 : i32
    %c0_i32_0 = arith.constant 0 : i32
    %c0_i32_1 = arith.constant 0 : i32
    return %c0_i32, %c0_i32_0 : i32, i32
  }
  func.func @transform_2(%arg0: i32) -> (i32, i32) {
    %c0_i32 = arith.constant 0 : i32
    %c0_i32_0 = arith.constant 0 : i32
    %c0_i32_1 = arith.constant 0 : i32
    return %c0_i32, %c0_i32_0 : i32, i32
  }
  func.func @transform_3(%arg0: i32) -> (i32, i32) {
    %c0_i32 = arith.constant 0 : i32
    %c0_i32_0 = arith.constant 0 : i32
    %c0_i32_1 = arith.constant 0 : i32
    return %c0_i32, %c0_i32_0 : i32, i32
  }
  func.func @transform_4(%arg0: i32) -> (i32, i32) {
    %c0_i32 = arith.constant 0 : i32
    %c0_i32_0 = arith.constant 0 : i32
    return %arg0, %c0_i32 : i32, i32
  }
  func.func @transform_5(%arg0: i32) -> (i32, i32) {
    %c0_i32 = arith.constant 0 : i32
    %c0_i32_0 = arith.constant 0 : i32
    return %arg0, %c0_i32 : i32, i32
  }
  func.func @transform_6(%arg0: i32) -> (i32, i32) {
    %c0_i32 = arith.constant 0 : i32
    %c0_i32_0 = arith.constant 0 : i32
    return %arg0, %c0_i32 : i32, i32
  }
}

</mosaic_0001>

<bundles_post_ra>
// kernel: tpu_custom_call.1
= control target key start
LH: loop header
LB: loop body
LE: loop exit
PB: predicated region body
PF: predicated region fallthrough
CT: control target
= control target key end

     0   :  { %12 = vsyncpa [#allocation3], 0  ;;  %s2920_s0 = inlined_call_operand.hbm [shape: f32[512,128], index: 0, kind: input, shape index: {}]   ;;  %s2921_s1 = inlined_call_operand.hbm [shape: f32[256,128], index: 1, kind: input, shape index: {}]   ;;  %s2922_s2 = inlined_call_operand.hbm [shape: f32[128,256], index: 2, kind: input, shape index: {}]   ;;  %s2923_s3 = inlined_call_operand.vmem [shape: f32[1,256], index: 3, kind: input, shape index: {}]   ;;  %s2924_s4 = inlined_call_operand.hbm [shape: f32[512,128], index: 4, kind: output, shape index: {0}]   ;;  %s2925_s5 = inlined_call_operand.vmem [shape: s32[512,1], index: 5, kind: output, shape index: {1}]   ;;  %s2926_s6 = inlined_call_operand.vmem [shape: f32[512,1], index: 6, kind: output, shape index: {2}]  }
   0x1   :  { %14 = vsyncpa [#allocation3 + $0x1], 0 }
   0x2   :  { %15 = vsyncpa [#allocation6], 0 }
   0x3   :  { %16 = vsyncpa [#allocation4], 0 }
   0x4   :  { %18 = vsyncpa [#allocation4 + $0x1], 0  ;;  %s2072_s21 = smov 0   ;;  %s2074_s22 = smov 0  }
   0x5   :  { %s2076_s23 = smov 0   ;;  %s2078_s24 = smov 0  }
   0x6 LB: > { %s2093_s25 = sadd.s32 4294967295, %s2023_s24   ;;  %s1544_s26 = sadd.s32 4294967294, %s2023_s24   ;;  %s2023_s24 = sphi %s2078_s24, %s2945_s24   ;;  %s2019_s23 = sphi %s2076_s23, %s2944_s23   ;;  %s2015_s22 = sphi %s2074_s22, %s2943_s22   ;;  %s2011_s21 = sphi %s2072_s21, %s2942_s21  }
   0x7   : > { %p44_p0 = scmp.ne.s32.totalorder %s2015_s22, %s2011_s21  ;;  %p2927_p1 = scmp.eq.s32.totalorder %s2093_s25, 0 }
   0x8   : > { %p137_p3 = scmp.eq.s32.totalorder %s1544_s26, 3  ;;  %p1545_p5 = scmp.ge.s32.totalorder %s2023_s24, 1 }
   0x9   : > { %p2102_p4 = por %p2927_p1, %p44_p0  ;;  %p196_p7 = scmp.lt.s32.totalorder %s2023_s24, 5 }
   0xa   : > { %p2107_p6 = por %p137_p3, %p44_p0  ;;  %s2025_s30 = smov [#allocation5]  }
   0xb   : > { %s2930_s27 = scalar_select %p2102_p4, 1, 0 }
   0xc   : > { %s2931_s28 = scalar_select %p2107_p6, 1, 0 }
   0xd   : > { %p2112_p8 = pnand %p1545_p5, %p196_p7  ;;  %s208_s7 = sshll.u32 %s2025_s30, 4  ;;  %s209_s7 = int_to_ptr.vmem [resolvable:$true] %s208_s7 }
   0xe   : > { %s2026_s9 = smov [#allocation7]   ;;  %s1867_s13 = scalar_lea.hbm %s2921_s1, 4096 }
   0xf   : > { %s2932_s29 = scalar_select %p2112_p8, 1, 0 }
  0x10   : > { %p1788_p9 = pneg %p2112_p8  ;;  %s221_s10 = sshll.u32 %s2026_s9, 4  ;;  %s2124_s10 = int_to_ptr.vmem [resolvable:$true] %s221_s10 }
  0x11   : > { %p1868_p11 = scmp.ne.s32.totalorder %s2921_s1, %s1867_s13  ;;  %p1874_p3 = scmp.lt.u32.totalorder %s1867_s13, %s2921_s1 }
  0x12   : > { %p2120_p10 = pnand %p1788_p9, %p2927_p1 }
  0x14   : > { %p1869_p12 = pneg %p2120_p10 }
  0x16   : > { %p1870_p13 = pnand %p1869_p12, %p1868_p11 }
  0x18   : > { %p1871_p0 = pneg %p1870_p13 }
  0x1a   : > { %p1876_p5 = pnand %p1874_p3, %p1871_p0 }
  0x1c   : > { %1879 = shalt.err (!%p1876_p5)
}
  0x1d   : > { %s1880_s18 = scalar_lea.vmem %s209_s7, 4096  ;;  %p1888_p2 = scmp.lt.s32.totalorder %s209_s7, %s209_s7 }
  0x1e   : > { %p1881_p7 = scmp.ne.s32.totalorder %s209_s7, %s1880_s18  ;;  %p1889_p6 = scmp.lt.s32.totalorder %s1880_s18, %s1880_s18 }
  0x20   : > { %p1883_p9 = pnand %p1881_p7, %p1869_p12  ;;  %p1890_p4 = por %p1889_p6, %p1888_p2 }
  0x22   : > { %p1884_p1 = pneg %p1883_p9 }
  0x24   : > { %p1891_p8 = pnand %p1890_p4, %p1884_p1 }
  0x26   : > { %1894 = shalt.err (!%p1891_p8)
}
  0x27   : > { %s2027_s19 = smov 128   ;;  %s2028_s20 = smov 8  }
  0x28   : > { %1791 = dma.hbm_to_vmem [thread:$0]  (!%p2120_p10), %s2921_s1, 4096, %s209_s7, [#allocation6], %s2027_s19, %s2027_s19, %s2028_s20  }
  0x29   : > { %s1895_s12 = scalar_lea.hbm %s2922_s2, 4096 }
  0x2a   : > { %p1896_p1 = scmp.ne.s32.totalorder %s2922_s2, %s1895_s12  ;;  %p1902_p6 = scmp.lt.u32.totalorder %s1895_s12, %s2922_s2 }
  0x2c   : > { %p1898_p2 = pnand %p1896_p1, %p1869_p12 }
  0x2e   : > { %p1899_p4 = pneg %p1898_p2 }
  0x30   : > { %p1904_p8 = pnand %p1902_p6, %p1899_p4 }
  0x32   : > { %1907 = shalt.err (!%p1904_p8)
}
  0x33   : > { %s1908_s7 = scalar_lea.vmem %s2124_s10, 4096  ;;  %p1916_p3 = scmp.lt.s32.totalorder %s2124_s10, %s2124_s10 }
  0x34   : > { %p1909_p11 = scmp.ne.s32.totalorder %s2124_s10, %s1908_s7  ;;  %p1917_p5 = scmp.lt.s32.totalorder %s1908_s7, %s1908_s7 }
  0x36   : > { %p1911_p13 = pnand %p1909_p11, %p1869_p12  ;;  %p1918_p7 = por %p1917_p5, %p1916_p3 }
  0x38   : > { %p1912_p0 = pneg %p1911_p13 }
  0x3a   : > { %p1919_p9 = pnand %p1918_p7, %p1912_p0 }
  0x3c   : > { %1922 = shalt.err (!%p1919_p9)
}
  0x3d   : > { %s2029_s17 = smov 256   ;;  %s2030_s18 = smov 16  }
  0x3e   : > { %1794 = dma.hbm_to_vmem [thread:$0]  (!%p2120_p10), %s2922_s2, 4096, %s2124_s10, [#allocation6], %s2029_s17, %s2029_s17, %s2030_s18  }
  0x3f   : > { %s2177_s9 = sadd.s32 1, %s2023_s24   ;;  %s31_s12 = sadd.s32 1, %s2019_s23 }
  0x40   : > { %s28_s11 = ssub.s32 %s2023_s24, %s2177_s9  ;;  %p38_p1 = scmp.ne.s32.totalorder %s2019_s23, %s2015_s22 }
  0x41   : > { %p29_p12 = scmp.eq.s32.totalorder %s28_s11, 0  ;;  %p39_p2 = scmp.eq.s32.totalorder %s2023_s24, 0 }
  0x42   : > { %p2934_p6 = scmp.eq.s32.totalorder %s2093_s25, 3  ;;  %p1805_p11 = scmp.lt.s32.totalorder %s2023_s24, 4 }
  0x43   : > { %s2186_s13 = scalar_select %p29_p12, %s2019_s23, %s31_s12  }
  0x44   : > { %p40_p4 = por %p39_p2, %p38_p1  ;;  %p2190_p8 = por %p2934_p6, %p38_p1 }
  0x45   : > { %s238_s8 = sand.u32 1, %s2019_s23   ;;  %s1630_s10 = sshll.u32 %s2023_s24, 11 }
  0x46   : > { %s1549_s15 = sshll.u32 %s238_s8, 7  ;;  %s2200_s17 = scalar_lea.hbm %s2920_s0, %s1630_s10 }
  0x47   : > { %s242_s18 = scalar_lea.vmem [#allocation2], %s1549_s15  ;;  %p2204_p10 = pnand %p1805_p11, %p40_p4 }
  0x48   : > { %s249_s26 = sshll.u32 %s242_s18, 4  ;;  %s2208_s11 = scalar_lea.sflag [#allocation3], %s238_s8  ;;  %s2202_s26 = int_to_ptr.vmem [resolvable:$true] %s249_s26 }
  0x49   : > { %s1923_s12 = scalar_lea.hbm %s2200_s17, 2048  ;;  %p1925_p0 = pneg %p2204_p10 }
  0x4a   : > { %p1924_p13 = scmp.ne.s32.totalorder %s2200_s17, %s1923_s12  ;;  %s1928_s16 = scalar_lea.hbm %s2920_s0, 8192 }
  0x4b   : > { %p1929_p7 = scmp.lt.u32.totalorder %s2200_s17, %s2920_s0  ;;  %p1930_p9 = scmp.lt.u32.totalorder %s1928_s16, %s1923_s12 }
  0x4c   : > { %p1926_p3 = pnand %p1925_p0, %p1924_p13  ;;  %p1932_p1 = scmp.lt.u32.totalorder %s1923_s12, %s2200_s17 }
  0x4d   : > { %p1931_p12 = por %p1930_p9, %p1929_p7 }
  0x4e   : > { %p1927_p5 = pneg %p1926_p3 }
  0x4f   : > { %p1933_p2 = por %p1932_p1, %p1931_p12 }
  0x51   : > { %p1934_p4 = pnand %p1933_p2, %p1927_p5 }
  0x53   : > { %1937 = shalt.err (!%p1934_p4)
}
  0x54   : > { %s1938_s8 = scalar_lea.vmem %s2202_s26, 2048  ;;  %s2031_s15 = smov [#allocation2]  }
  0x55   : > { %p1939_p6 = scmp.ne.s32.totalorder %s2202_s26, %s1938_s8  ;;  %s1943_s10 = sshll.u32 %s2031_s15, 4  ;;  %s1944_s10 = int_to_ptr.vmem [resolvable:$false] %s1943_s10 }
  0x56   : > { %s1945_s7 = scalar_lea.vmem %s1944_s10, 4096  ;;  %p1946_p3 = scmp.lt.s32.totalorder %s2202_s26, %s1944_s10 }
  0x57   : > { %p1941_p11 = pnand %p1939_p6, %p1925_p0  ;;  %p1947_p7 = scmp.lt.s32.totalorder %s1945_s7, %s1938_s8 }
  0x59   : > { %p1942_p13 = pneg %p1941_p11  ;;  %p1948_p9 = por %p1947_p7, %p1946_p3 }
  0x5b   : > { %p1949_p12 = pnand %p1948_p9, %p1942_p13 }
  0x5d   : > { %1952 = shalt.err (!%p1949_p12)
}
  0x5e   : > { %1798 = dma.hbm_to_vmem [thread:$0]  (!%p2204_p10), %s2200_s17, 2048, %s2202_s26, %s2208_s11, %s2027_s19, %s2027_s19, %s2028_s20  }
  0x5f   : > { %p2937_p0 = scmp.ne.s32.totalorder %s2932_s29, 0 }
  0x60   : > { %s2242_s12 = sand.u32 (!%p2937_p0), 1, %s2015_s22   ;;  %p2938_p5 = scmp.ne.s32.totalorder (!%p2937_p0), %s2930_s27, 0 }
  0x61   : > { %261 = sbr.rel (%p2937_p0) target bundleno = 1226 (0x4ca), region = 36  ;;  %s1553_s16 = sshll.u32 (!%p2937_p0), %s2242_s12, 7 }
  0x62   : > { %s264_s18 = scalar_lea.sflag (!%p2937_p0), [#allocation3], %s2242_s12  ;;  %s2248_s30 = scalar_lea.vmem (!%p2937_p0), [#allocation2], %s1553_s16 }
  0x68   : > { %1998 = dma.done.wait (%p2938_p5), %s264_s18, 2048  }
  0x69   : > { %2000 = vsyncadd (%p2938_p5), %s264_s18, 4294965248  ;;  %p2939_p10 = scmp.eq.s32.totalorder %s2093_s25, 0 }
  0x6b   : > { %2002 = dma.done.wait (%p2939_p10), [#allocation6], 8192   ;;  %p2940_p1 = pmov %p2939_p10 }
  0x6c   : > { %v2032_v0 = vmov 0.0   ;;  %v345_v1 = vld [vmem:[#allocation7 + $0x8] sm:$0xff]  ;;  %v347_v2 = vld [vmem:[#allocation7 + $0x18] sm:$0xff]  ;;  %v344_v3 = vld [vmem:[#allocation7] sm:$0xff]  ;;  %s1557_s19 = sshll.u32 %s2093_s25, 4  ;;  %s2797_s8 = scalar_lea.vmem [#allocation8], %s1553_s16 }
  0x6d   : > { %2004 = vsyncadd (%p2940_p1), [#allocation6], 4294959104  ;;  %440 = vmatprep.mubr.f32.mxu0 %v2032_v0  ;;  %v1712_v4 = vpack.c.bf16 %v347_v2, %v345_v1  ;;  %v346_v5 = vld [vmem:[#allocation7 + $0x10] sm:$0xff]  ;;  %v349_v6 = vld [vmem:[#allocation7 + $0x28] sm:$0xff]  ;;  %v571_v2 = vlaneseq  ;;  %p317_p2 = scmp.lt.s32.totalorder %s1557_s19, 63  ;;  %s1631_s15 = sshll.u32 %s2093_s25, 11 }
  0x6e   : > { %v351_v7 = vld [vmem:[#allocation7 + $0x38] sm:$0xff]  ;;  %v1714_v8 = vpack.c.bf16 %v346_v5, %v344_v3  ;;  %v348_v10 = vld [vmem:[#allocation7 + $0x20] sm:$0xff]  ;;  %v350_v11 = vld [vmem:[#allocation7 + $0x30] sm:$0xff]  ;;  %s1394_s10 = sshll.u32 %s2797_s8, 4  ;;  %s2836_s18 = scalar_lea.hbm %s2924_s4, %s1631_s15  ;;  %s2838_s10 = int_to_ptr.vmem [resolvable:$true] %s1394_s10 }
  0x6f   : > { %v1716_v9 = vpack.c.bf16 %v351_v7, %v349_v6  ;;  %v353_v12 = vld [vmem:[#allocation7 + $0x48] sm:$0xff]  ;;  %1713 = vmatprep.subr.bf16.mxu0 %v1712_v4  ;;  %v355_v13 = vld [vmem:[#allocation7 + $0x58] sm:$0xff]  ;;  %v1718_v14 = vpack.c.bf16 %v350_v11, %v348_v10  ;;  %v352_v16 = vld [vmem:[#allocation7 + $0x40] sm:$0xff]  ;;  %v572_v3 = vshrl.u32 %v571_v2, 7  ;;  %s2947_s19 = smov (!%p317_p2, %s1557_s19), 63  ;;  %s1371_s27 = scalar_lea.sflag [#allocation4], %s2242_s12 }
  0x70   : > { %1715 = vmatpush1.bf16.msra.mxu0 %v1714_v8  ;;  %v1720_v15 = vpack.c.bf16 %v355_v13, %v353_v12  ;;  %v354_v17 = vld [vmem:[#allocation7 + $0x50] sm:$0xff]  ;;  %v357_v18 = vld [vmem:[#allocation7 + $0x68] sm:$0xff]  ;;  %v359_v19 = vld [vmem:[#allocation7 + $0x78] sm:$0xff]  ;;  %s1558_s20 = sshll.u32 %s2947_s19, 3  ;;  %s1953_s29 = scalar_lea.vmem %s2838_s10, 2048 }
  0x71   : > { %1717 = vmatprep.subr.bf16.mxu0 %v1716_v9  ;;  %v1722_v20 = vpack.c.bf16 %v354_v17, %v352_v16  ;;  %v1724_v21 = vpack.c.bf16 %v359_v19, %v357_v18  ;;  %v356_v22 = vld [vmem:[#allocation7 + $0x60] sm:$0xff]  ;;  %v358_v23 = vld [vmem:[#allocation7 + $0x70] sm:$0xff]  ;;  %v361_v24 = vld [vmem:[#allocation7 + $0x88] sm:$0xff]  ;;  %v573_v4 = vsub.s32 0, %v572_v3  ;;  %v577_v6 = vsub.s32 1, %v572_v3  ;;  %s2683_s11 = scalar_lea.vmem %s2925_s5, %s1558_s20  ;;  %p1954_p4 = scmp.ne.s32.totalorder %s2838_s10, %s1953_s29 }
  0x72   : > { %v363_v25 = vld [vmem:[#allocation7 + $0x98] sm:$0xff]  ;;  %v1726_v26 = vpack.c.bf16 %v358_v23, %v356_v22  ;;  %v360_v28 = vld [vmem:[#allocation7 + $0x80] sm:$0xff]  ;;  %v362_v29 = vld [vmem:[#allocation7 + $0x90] sm:$0xff] }
  0x73   : > { %v1728_v27 = vpack.c.bf16 %v363_v25, %v361_v24  ;;  %v365_v30 = vld [vmem:[#allocation7 + $0xa8] sm:$0xff]  ;;  %v367_v31 = vld [vmem:[#allocation7 + $0xb8] sm:$0xff]  ;;  %v1730_v32 = vpack.c.bf16 %v362_v29, %v360_v28  ;;  %v364_v34 = vld [vmem:[#allocation7 + $0xa0] sm:$0xff]  ;;  %p1955_p6 = pnand %p1954_p4, %p2190_p8 }
  0x74   : > { %1719 = vmatpush1.bf16.msra.mxu0 %v1718_v14  ;;  %v1732_v33 = vpack.c.bf16 %v367_v31, %v365_v30  ;;  %v366_v35 = vld [vmem:[#allocation7 + $0xb0] sm:$0xff]  ;;  %v369_v36 = vld [vmem:[#allocation7 + $0xc8] sm:$0xff]  ;;  %v371_v37 = vld [vmem:[#allocation7 + $0xd8] sm:$0xff] }
  0x75   : > { %1721 = vmatprep.subr.bf16.mxu0 %v1720_v15  ;;  %v1734_v38 = vpack.c.bf16 %v366_v35, %v364_v34  ;;  %v1736_v39 = vpack.c.bf16 %v371_v37, %v369_v36  ;;  %v368_v40 = vld [vmem:[#allocation7 + $0xc0] sm:$0xff]  ;;  %v370_v41 = vld [vmem:[#allocation7 + $0xd0] sm:$0xff]  ;;  %v373_v42 = vld [vmem:[#allocation7 + $0xe8] sm:$0xff]  ;;  %p1956_p11 = pneg %p1955_p6 }
  0x76   : > { %v375_v43 = vld [vmem:[#allocation7 + $0xf8] sm:$0xff]  ;;  %v1738_v44 = vpack.c.bf16 %v370_v41, %v368_v40  ;;  %v372_v46 = vld [vmem:[#allocation7 + $0xe0] sm:$0xff]  ;;  %v374_v47 = vld [vmem:[#allocation7 + $0xf0] sm:$0xff] }
  0x77   : > { %v1740_v45 = vpack.c.bf16 %v375_v43, %v373_v42  ;;  %v1742_v48 = vpack.c.bf16 %v374_v47, %v372_v46  ;;  %v328_v49 = vld [vmem:[%s2248_s30] sm:$0xff]  ;;  %v329_v50 = vld [vmem:[%s2248_s30 + $0x8] sm:$0xff]  ;;  %v330_v51 = vld [vmem:[%s2248_s30 + $0x10] sm:$0xff] }
  0x78   : > { %1723 = vmatpush1.bf16.msra.mxu0 %v1722_v20  ;;  %v331_v52 = vld [vmem:[%s2248_s30 + $0x18] sm:$0xff]  ;;  %v332_v53 = vld [vmem:[%s2248_s30 + $0x20] sm:$0xff]  ;;  %v333_v54 = vld [vmem:[%s2248_s30 + $0x28] sm:$0xff] }
  0x79   : > { %1725 = vmatprep.subr.bf16.mxu0 %v1724_v21  ;;  %v334_v55 = vld [vmem:[%s2248_s30 + $0x30] sm:$0xff]  ;;  %v335_v56 = vld [vmem:[%s2248_s30 + $0x38] sm:$0xff]  ;;  %v336_v57 = vld [vmem:[%s2248_s30 + $0x40] sm:$0xff] }
  0x7a   : > { %v337_v58 = vld [vmem:[%s2248_s30 + $0x48] sm:$0xff]  ;;  %v338_v59 = vld [vmem:[%s2248_s30 + $0x50] sm:$0xff]  ;;  %v339_v60 = vld [vmem:[%s2248_s30 + $0x58] sm:$0xff] }
  0x7b   : > { %v340_v61 = vld [vmem:[%s2248_s30 + $0x60] sm:$0xff]  ;;  %v341_v62 = vld [vmem:[%s2248_s30 + $0x68] sm:$0xff]  ;;  %v342_v63 = vld [vmem:[%s2248_s30 + $0x70] sm:$0xff] }
  0x7c   : > { %1727 = vmatpush1.bf16.msra.mxu0 %v1726_v26  ;;  %v343_v1 = vld [vmem:[%s2248_s30 + $0x78] sm:$0xff]  ;;  %v537_v5 = vld [vmem:[%s2923_s3] sm:$0x3] }
  0x7d   : > { %1729 = vmatprep.subr.bf16.mxu0 %v1728_v27  ;;  %v2294_v7 = vrot.slane %v537_v5, %v573_v4  ;;  %v2296_v9 = vrot.slane %v537_v5, %v577_v6 }
  0x80   : > { %1731 = vmatpush1.bf16.msra.mxu0 %v1730_v32 }
  0x81   : > { %1733 = vmatprep.subr.bf16.mxu0 %v1732_v33 }
  0x84   : > { %1735 = vmatpush1.bf16.msra.mxu0 %v1734_v38 }
  0x85   : > { %1737 = vmatprep.subr.bf16.mxu0 %v1736_v39 }
  0x88   : > { %1739 = vmatpush1.bf16.msra.mxu0 %v1738_v44 }
  0x89   : > { %1741 = vmatprep.subr.bf16.mxu0 %v1740_v45 }
  0x8c   : > { %1743 = vmatpush1.bf16.msra.mxu0 %v1742_v48 }
  0x8f   : > { %441 = vmatmul.mubr.f32.vlgmr.msra.gmra.mrb[0].mxu0 %v328_v49 }
  0x90   : > { %446 = vmatprep.mubr.f32.mxu0 %v2032_v0 }
  0x93   : > { %447 = vmatmul.mubr.f32.gmra.mrb[2].mxu0 %v329_v50 }
  0x94   : > { %452 = vmatprep.mubr.f32.mxu0 %v2032_v0 }
  0x97   : > { %453 = vmatmul.mubr.f32.gmra.mrb[4].mxu0 %v330_v51 }
  0x98   : > { %458 = vmatprep.mubr.f32.mxu0 %v2032_v0 }
  0x9b   : > { %459 = vmatmul.mubr.f32.gmra.mrb[6].mxu0 %v331_v52 }
  0x9c   : > { %464 = vmatprep.mubr.f32.mxu0 %v2032_v0 }
  0x9f   : > { %465 = vmatmul.mubr.f32.gmra.mrb[8].mxu0 %v332_v53 }
  0xa0   : > { %470 = vmatprep.mubr.f32.mxu0 %v2032_v0 }
  0xa3   : > { %471 = vmatmul.mubr.f32.gmra.mrb[10].mxu0 %v333_v54 }
  0xa4   : > { %476 = vmatprep.mubr.f32.mxu0 %v2032_v0 }
  0xa7   : > { %477 = vmatmul.mubr.f32.gmra.mrb[12].mxu0 %v334_v55 }
  0xa8   : > { %482 = vmatprep.mubr.f32.mxu0 %v2032_v0 }
  0xab   : > { %483 = vmatmul.mubr.f32.gmra.mrb[14].mxu0 %v335_v56 }
  0xac   : > { %488 = vmatprep.mubr.f32.mxu0 %v2032_v0 }
  0xaf   : > { %489 = vmatmul.mubr.f32.gmra.mrb[16].mxu0 %v336_v57 }
  0xb0   : > { %494 = vmatprep.mubr.f32.mxu0 %v2032_v0 }
  0xb3   : > { %495 = vmatmul.mubr.f32.gmra.mrb[18].mxu0 %v337_v58 }
  0xb4   : > { %500 = vmatprep.mubr.f32.mxu0 %v2032_v0 }
  0xb7   : > { %501 = vmatmul.mubr.f32.gmra.mrb[20].mxu0 %v338_v59 }
  0xb8   : > { %506 = vmatprep.mubr.f32.mxu0 %v2032_v0 }
  0xbb   : > { %507 = vmatmul.mubr.f32.gmra.mrb[22].mxu0 %v339_v60 }
  0xbc   : > { %512 = vmatprep.mubr.f32.mxu0 %v2032_v0 }
  0xbf   : > { %513 = vmatmul.mubr.f32.gmra.mrb[24].mxu0 %v340_v61 }
  0xc0   : > { %518 = vmatprep.mubr.f32.mxu0 %v2032_v0 }
  0xc3   : > { %519 = vmatmul.mubr.f32.gmra.mrb[26].mxu0 %v341_v62 }
  0xc4   : > { %524 = vmatprep.mubr.f32.mxu0 %v2032_v0 }
  0xc7   : > { %525 = vmatmul.mubr.f32.gmra.mrb[28].mxu0 %v342_v63 }
  0xc8   : > { %530 = vmatprep.mubr.f32.mxu0 %v2032_v0 }
  0xcb   : > { %531 = vmatmul.mubr.f32.gmra.mrb[30].mxu0 %v343_v1 }
 0x162   : > { %v442_v8 = vpop.f32.mrb[0].mxu0 }
 0x163   : > { %v538_v10 = vmul.f32 2.0, %v442_v8  ;;  %v444_v11 = vpop.f32.mrb[1].mxu0 }
 0x164   : > { %v539_v12 = vmul.f32 2.0, %v444_v11 }
 0x165   : > { %v2299_v0 = vsub.f32 %v2294_v7, %v538_v10 }
 0x166   : > { %v448_v13 = vpop.f32.mrb[2].mxu0  ;;  %v2302_v14 = vsub.f32 %v2296_v9, %v539_v12 }
 0x167   : > { %v540_v15 = vmul.f32 2.0, %v448_v13  ;;  %v450_v16 = vpop.f32.mrb[3].mxu0 }
 0x168   : > { %v541_v17 = vmul.f32 2.0, %v450_v16  ;;  %v613_v18 = vmin.f32 %v2299_v0, %v2302_v14 }
 0x169   : > { %v2307_v19 = vsub.f32 %v2294_v7, %v540_v15 }
 0x16a   : > { %v2310_v20 = vsub.f32 %v2296_v9, %v541_v17  ;;  %614 = vmin.xlane.f32.xlu0 %v613_v18  ;;  %v454_v21 = vpop.f32.mrb[4].mxu0 }
 0x16b   : > { %v542_v22 = vmul.f32 2.0, %v454_v21  ;;  %v456_v23 = vpop.f32.mrb[5].mxu0 }
 0x16c   : > { %v543_v24 = vmul.f32 2.0, %v456_v23  ;;  %v616_v25 = vmin.f32 %v2307_v19, %v2310_v20 }
 0x16d   : > { %v2315_v26 = vsub.f32 %v2294_v7, %v542_v22 }
 0x16e   : > { %617 = vmin.xlane.f32.xlu0 %v616_v25  ;;  %v460_v27 = vpop.f32.mrb[6].mxu0  ;;  %v2318_v28 = vsub.f32 %v2296_v9, %v543_v24 }
 0x16f   : > { %v544_v29 = vmul.f32 2.0, %v460_v27  ;;  %v462_v30 = vpop.f32.mrb[7].mxu0 }
 0x170   : > { %v545_v31 = vmul.f32 2.0, %v462_v30  ;;  %v619_v32 = vmin.f32 %v2315_v26, %v2318_v28 }
 0x171   : > { %v2323_v33 = vsub.f32 %v2294_v7, %v544_v29 }
 0x172   : > { %v2326_v34 = vsub.f32 %v2296_v9, %v545_v31  ;;  %620 = vmin.xlane.f32.xlu1 %v619_v32  ;;  %v466_v35 = vpop.f32.mrb[8].mxu0 }
 0x173   : > { %v546_v36 = vmul.f32 2.0, %v466_v35  ;;  %v468_v37 = vpop.f32.mrb[9].mxu0 }
 0x174   : > { %v547_v38 = vmul.f32 2.0, %v468_v37  ;;  %v622_v39 = vmin.f32 %v2323_v33, %v2326_v34 }
 0x175   : > { %v2331_v40 = vsub.f32 %v2294_v7, %v546_v36 }
 0x176   : > { %v2334_v41 = vsub.f32 %v2296_v9, %v547_v38  ;;  %623 = vmin.xlane.f32.xlu1 %v622_v39  ;;  %v472_v42 = vpop.f32.mrb[10].mxu0 }
 0x177   : > { %v548_v43 = vmul.f32 2.0, %v472_v42  ;;  %v474_v44 = vpop.f32.mrb[11].mxu0 }
 0x178   : > { %v549_v45 = vmul.f32 2.0, %v474_v44  ;;  %v625_v46 = vmin.f32 %v2331_v40, %v2334_v41 }
 0x179   : > { %v2339_v47 = vsub.f32 %v2294_v7, %v548_v43 }
 0x17a   : > { %v2342_v48 = vsub.f32 %v2296_v9, %v549_v45  ;;  %626 = vmin.xlane.f32.xlu0 %v625_v46  ;;  %v478_v49 = vpop.f32.mrb[12].mxu0 }
 0x17b   : > { %v550_v50 = vmul.f32 2.0, %v478_v49  ;;  %v480_v51 = vpop.f32.mrb[13].mxu0 }
 0x17c   : > { %v551_v52 = vmul.f32 2.0, %v480_v51  ;;  %v628_v53 = vmin.f32 %v2339_v47, %v2342_v48 }
 0x17d   : > { %v2347_v54 = vsub.f32 %v2294_v7, %v550_v50 }
 0x17e   : > { %v2350_v55 = vsub.f32 %v2296_v9, %v551_v52  ;;  %629 = vmin.xlane.f32.xlu1 %v628_v53  ;;  %v484_v56 = vpop.f32.mrb[14].mxu0 }
 0x17f   : > { %v552_v57 = vmul.f32 2.0, %v484_v56  ;;  %v486_v58 = vpop.f32.mrb[15].mxu0 }
 0x180   : > { %v553_v59 = vmul.f32 2.0, %v486_v58  ;;  %v631_v60 = vmin.f32 %v2347_v54, %v2350_v55 }
 0x181   : > { %v2355_v61 = vsub.f32 %v2294_v7, %v552_v57 }
 0x182   : > { %v2358_v62 = vsub.f32 %v2296_v9, %v553_v59  ;;  %632 = vmin.xlane.f32.xlu0 %v631_v60  ;;  %v490_v63 = vpop.f32.mrb[16].mxu0 }
 0x183   : > { %v554_v1 = vmul.f32 2.0, %v490_v63  ;;  %v492_v3 = vpop.f32.mrb[17].mxu0 }
 0x184   : > { %v555_v4 = vmul.f32 2.0, %v492_v3  ;;  %v634_v5 = vmin.f32 %v2355_v61, %v2358_v62 }
 0x185   : > { %v2363_v6 = vsub.f32 %v2294_v7, %v554_v1 }
 0x186   : > { %v2366_v8 = vsub.f32 %v2296_v9, %v555_v4  ;;  %635 = vmin.xlane.f32.xlu1 %v634_v5  ;;  %v496_v10 = vpop.f32.mrb[18].mxu0 }
 0x187   : > { %v556_v11 = vmul.f32 2.0, %v496_v10  ;;  %v498_v12 = vpop.f32.mrb[19].mxu0 }
 0x188   : > { %v557_v13 = vmul.f32 2.0, %v498_v12  ;;  %v637_v15 = vmin.f32 %v2363_v6, %v2366_v8 }
 0x189   : > { %v2371_v16 = vsub.f32 %v2294_v7, %v556_v11 }
 0x18a   : > { %v2374_v17 = vsub.f32 %v2296_v9, %v557_v13  ;;  %638 = vmin.xlane.f32.xlu0 %v637_v15  ;;  %v502_v18 = vpop.f32.mrb[20].mxu0 }
 0x18b   : > { %v558_v21 = vmul.f32 2.0, %v502_v18  ;;  %v504_v22 = vpop.f32.mrb[21].mxu0 }
 0x18c   : > { %v559_v23 = vmul.f32 2.0, %v504_v22  ;;  %v640_v24 = vmin.f32 %v2371_v16, %v2374_v17  ;;  %v2427_v22 = vand.u32 127, %v571_v2 }
 0x18d   : > { %v2379_v25 = vsub.f32 %v2294_v7, %v558_v21 }
 0x18e   : > { %v2382_v27 = vsub.f32 %v2296_v9, %v559_v23  ;;  %641 = vmin.xlane.f32.xlu1 %v640_v24  ;;  %v508_v29 = vpop.f32.mrb[22].mxu0  ;;  %v2430_v23 = vadd.s32 128, %v2427_v22 }
 0x18f   : > { %v560_v30 = vmul.f32 2.0, %v508_v29  ;;  %v510_v31 = vpop.f32.mrb[23].mxu0 }
 0x190   : > { %v561_v32 = vmul.f32 2.0, %v510_v31  ;;  %v643_v35 = vmin.f32 %v2379_v25, %v2382_v27 }
 0x191   : > { %v2387_v36 = vsub.f32 %v2294_v7, %v560_v30 }
 0x192   : > { %v2390_v37 = vsub.f32 %v2296_v9, %v561_v32  ;;  %644 = vmin.xlane.f32.xlu0 %v643_v35  ;;  %v514_v38 = vpop.f32.mrb[24].mxu0 }
 0x193   : > { %v562_v39 = vmul.f32 2.0, %v514_v38  ;;  %v516_v42 = vpop.f32.mrb[25].mxu0 }
 0x194   : > { %v563_v43 = vmul.f32 2.0, %v516_v42  ;;  %v646_v44 = vmin.f32 %v2387_v36, %v2390_v37 }
 0x195   : > { %v2395_v45 = vsub.f32 %v2294_v7, %v562_v39 }
 0x196   : > { %v2398_v46 = vsub.f32 %v2296_v9, %v563_v43  ;;  %647 = vmin.xlane.f32.xlu1 %v646_v44  ;;  %v520_v49 = vpop.f32.mrb[26].mxu0 }
 0x197   : > { %v564_v50 = vmul.f32 2.0, %v520_v49  ;;  %v522_v51 = vpop.f32.mrb[27].mxu0 }
 0x198   : > { %v565_v52 = vmul.f32 2.0, %v522_v51  ;;  %v649_v53 = vmin.f32 %v2395_v45, %v2398_v46 }
 0x199   : > { %v2403_v56 = vsub.f32 %v2294_v7, %v564_v50 }
 0x19a   : > { %v2406_v57 = vsub.f32 %v2296_v9, %v565_v52  ;;  %650 = vmin.xlane.f32.xlu0 %v649_v53  ;;  %v526_v58 = vpop.f32.mrb[28].mxu0 }
 0x19b   : > { %v566_v59 = vmul.f32 2.0, %v526_v58  ;;  %v528_v60 = vpop.f32.mrb[29].mxu0 }
 0x19c   : > { %v567_v63 = vmul.f32 2.0, %v528_v60  ;;  %v652_v1 = vmin.f32 %v2403_v56, %v2406_v57 }
 0x19d   : > { %v2411_v3 = vsub.f32 %v2294_v7, %v566_v59 }
 0x19e   : > { %v2414_v4 = vsub.f32 %v2296_v9, %v567_v63  ;;  %653 = vmin.xlane.f32.xlu1 %v652_v1  ;;  %v532_v5 = vpop.f32.mrb[30].mxu0 }
 0x19f   : > { %v568_v10 = vmul.f32 2.0, %v532_v5  ;;  %v534_v11 = vpop.f32.mrb[31].mxu0 }
 0x1a0   : > { %v569_v12 = vmul.f32 2.0, %v534_v11  ;;  %v655_v13 = vmin.f32 %v2411_v3, %v2414_v4 }
 0x1a1   : > { %v2419_v15 = vsub.f32 %v2294_v7, %v568_v10 }
 0x1a2   : > { %v2422_v18 = vsub.f32 %v2296_v9, %v569_v12  ;;  %656 = vmin.xlane.f32.xlu0 %v655_v13 }
 0x1a4   : > { %v658_v21 = vmin.f32 %v2419_v15, %v2422_v18 }
 0x1a6   : > { %659 = vmin.xlane.f32.xlu1 %v658_v21 }
 0x1f7   : > { %v615_v24 = vpop.xlane.xlu0 %614 }
 0x1f8   : > { %vm664_vm0 = vcmp.eq.f32.partialorder %v2299_v0, %v615_v24  ;;  %vm665_vm1 = vcmp.eq.f32.partialorder %v2302_v14, %v615_v24 }
 0x1f9   : > { %v696_v7 = vsel %vm664_vm0, %v2427_v22, 256  ;;  %v697_v9 = vsel %vm665_vm1, %v2430_v23, 256 }
 0x1fa   : > { %vm728_vm2 = vcmp.lt.s32.totalorder %v696_v7, %v697_v9 }
 0x1fb   : > { %v618_v29 = vpop.xlane.xlu0 %617  ;;  %v2436_v30 = vsel %vm728_vm2, %v696_v7, %v697_v9 }
 0x1fc   : > { %vm666_vm3 = vcmp.eq.f32.partialorder %v2307_v19, %v618_v29  ;;  %vm667_vm4 = vcmp.eq.f32.partialorder %v2310_v20, %v618_v29  ;;  %v731_v2 = vshra.s32 %v2436_v30, 16 }
 0x1fd   : > { %v698_v31 = vsel %vm666_vm3, %v2427_v22, 256  ;;  %v699_v0 = vsel %vm667_vm4, %v2430_v23, 256 }
 0x1fe   : > { %vm744_vm5 = vcmp.lt.s32.totalorder %v698_v31, %v699_v0  ;;  %v2443_v14 = vcvt.s32.f32 %v731_v2 }
 0x1ff   : > { %v621_v32 = vpop.xlane.xlu1 %620  ;;  %v2445_v35 = vsel %vm744_vm5, %v698_v31, %v699_v0 }
 0x200   : > { %vm668_vm6 = vcmp.eq.f32.partialorder %v2315_v26, %v621_v32  ;;  %vm669_vm7 = vcmp.eq.f32.partialorder %v2318_v28, %v621_v32  ;;  %734 = vmin.xlane.f32.xlu0 %v2443_v14  ;;  %v747_v19 = vshra.s32 %v2445_v35, 16 }
 0x201   : > { %v700_v20 = vsel %vm668_vm6, %v2427_v22, 256  ;;  %v701_v38 = vsel %vm669_vm7, %v2430_v23, 256 }
 0x202   : > { %vm760_vm8 = vcmp.lt.s32.totalorder %v700_v20, %v701_v38  ;;  %v2453_v39 = vcvt.s32.f32 %v747_v19 }
 0x203   : > { %v624_v42 = vpop.xlane.xlu1 %623  ;;  %v2455_v43 = vsel %vm760_vm8, %v700_v20, %v701_v38 }
 0x204   : > { %vm670_vm9 = vcmp.eq.f32.partialorder %v2323_v33, %v624_v42  ;;  %vm671_vm10 = vcmp.eq.f32.partialorder %v2326_v34, %v624_v42  ;;  %750 = vmin.xlane.f32.xlu1 %v2453_v39  ;;  %v763_v26 = vshra.s32 %v2455_v43, 16 }
 0x205   : > { %v702_v28 = vsel %vm670_vm9, %v2427_v22, 256  ;;  %v703_v44 = vsel %vm671_vm10, %v2430_v23, 256 }
 0x206   : > { %vm776_vm11 = vcmp.lt.s32.totalorder %v702_v28, %v703_v44  ;;  %v2463_v49 = vcvt.s32.f32 %v763_v26 }
 0x207   : > { %v627_v50 = vpop.xlane.xlu0 %626  ;;  %v2465_v51 = vsel %vm776_vm11, %v702_v28, %v703_v44 }
 0x208   : > { %vm672_vm12 = vcmp.eq.f32.partialorder %v2331_v40, %v627_v50  ;;  %vm673_vm13 = vcmp.eq.f32.partialorder %v2334_v41, %v627_v50  ;;  %766 = vmin.xlane.f32.xlu0 %v2463_v49  ;;  %v779_v33 = vshra.s32 %v2465_v51, 16 }
 0x209   : > { %v704_v34 = vsel %vm672_vm12, %v2427_v22, 256  ;;  %v705_v52 = vsel %vm673_vm13, %v2430_v23, 256 }
 0x20a   : > { %vm792_vm14 = vcmp.lt.s32.totalorder %v704_v34, %v705_v52  ;;  %v2473_v53 = vcvt.s32.f32 %v779_v33 }
 0x20b   : > { %v630_v58 = vpop.xlane.xlu1 %629  ;;  %v2475_v59 = vsel %vm792_vm14, %v704_v34, %v705_v52 }
 0x20c   : > { %vm674_vm15 = vcmp.eq.f32.partialorder %v2339_v47, %v630_v58  ;;  %vm675_vm0 = vcmp.eq.f32.partialorder %v2342_v48, %v630_v58  ;;  %782 = vmin.xlane.f32.xlu1 %v2473_v53  ;;  %v795_v40 = vshra.s32 %v2475_v59, 16 }
 0x20d   : > { %v706_v41 = vsel %vm674_vm15, %v2427_v22, 256  ;;  %v707_v60 = vsel %vm675_vm0, %v2430_v23, 256 }
 0x20e   : > { %vm808_vm1 = vcmp.lt.s32.totalorder %v706_v41, %v707_v60  ;;  %v2483_v63 = vcvt.s32.f32 %v795_v40 }
 0x20f   : > { %v633_v1 = vpop.xlane.xlu0 %632  ;;  %v2485_v5 = vsel %vm808_vm1, %v706_v41, %v707_v60 }
 0x210   : > { %vm676_vm2 = vcmp.eq.f32.partialorder %v2347_v54, %v633_v1  ;;  %vm677_vm3 = vcmp.eq.f32.partialorder %v2350_v55, %v633_v1  ;;  %798 = vmin.xlane.f32.xlu0 %v2483_v63  ;;  %v811_v47 = vshra.s32 %v2485_v5, 16 }
 0x211   : > { %v708_v48 = vsel %vm676_vm2, %v2427_v22, 256  ;;  %v709_v10 = vsel %vm677_vm3, %v2430_v23, 256 }
 0x212   : > { %vm824_vm4 = vcmp.lt.s32.totalorder %v708_v48, %v709_v10  ;;  %v2493_v11 = vcvt.s32.f32 %v811_v47 }
 0x213   : > { %v636_v12 = vpop.xlane.xlu1 %635  ;;  %v2495_v13 = vsel %vm824_vm4, %v708_v48, %v709_v10 }
 0x214   : > { %vm678_vm5 = vcmp.eq.f32.partialorder %v2355_v61, %v636_v12  ;;  %vm679_vm6 = vcmp.eq.f32.partialorder %v2358_v62, %v636_v12  ;;  %814 = vmin.xlane.f32.xlu1 %v2493_v11  ;;  %v827_v54 = vshra.s32 %v2495_v13, 16 }
 0x215   : > { %v710_v55 = vsel %vm678_vm5, %v2427_v22, 256  ;;  %v711_v21 = vsel %vm679_vm6, %v2430_v23, 256 }
 0x216   : > { %vm840_vm7 = vcmp.lt.s32.totalorder %v710_v55, %v711_v21  ;;  %v2503_v24 = vcvt.s32.f32 %v827_v54 }
 0x217   : > { %v639_v7 = vpop.xlane.xlu0 %638  ;;  %v2505_v9 = vsel %vm840_vm7, %v710_v55, %v711_v21 }
 0x218   : > { %vm680_vm8 = vcmp.eq.f32.partialorder %v2363_v6, %v639_v7  ;;  %vm681_vm9 = vcmp.eq.f32.partialorder %v2366_v8, %v639_v7  ;;  %830 = vmin.xlane.f32.xlu0 %v2503_v24  ;;  %v843_v61 = vshra.s32 %v2505_v9, 16 }
 0x219   : > { %v712_v62 = vsel %vm680_vm8, %v2427_v22, 256  ;;  %v713_v29 = vsel %vm681_vm9, %v2430_v23, 256 }
 0x21a   : > { %vm856_vm10 = vcmp.lt.s32.totalorder %v712_v62, %v713_v29  ;;  %v2513_v2 = vcvt.s32.f32 %v843_v61 }
 0x21b   : > { %v642_v31 = vpop.xlane.xlu1 %641  ;;  %v2515_v0 = vsel %vm856_vm10, %v712_v62, %v713_v29 }
 0x21c   : > { %vm682_vm11 = vcmp.eq.f32.partialorder %v2371_v16, %v642_v31  ;;  %vm683_vm12 = vcmp.eq.f32.partialorder %v2374_v17, %v642_v31  ;;  %846 = vmin.xlane.f32.xlu1 %v2513_v2  ;;  %v859_v6 = vshra.s32 %v2515_v0, 16  ;;  %v1097_v31 = vld [vmem:[#allocation5 + $0x88] sm:$0xff] }
 0x21d   : > { %v714_v8 = vsel %vm682_vm11, %v2427_v22, 256  ;;  %v715_v32 = vsel %vm683_vm12, %v2430_v23, 256 }
 0x21e   : > { %vm872_vm13 = vcmp.lt.s32.totalorder %v714_v8, %v715_v32  ;;  %v2523_v19 = vcvt.s32.f32 %v859_v6  ;;  %v1080_v6 = vld [vmem:[#allocation5] sm:$0xff] }
 0x21f   : > { %v645_v20 = vpop.xlane.xlu0 %644  ;;  %v2525_v38 = vsel %vm872_vm13, %v714_v8, %v715_v32  ;;  %v1081_v32 = vld [vmem:[#allocation5 + $0x8] sm:$0xff] }
 0x220   : > { %vm684_vm14 = vcmp.eq.f32.partialorder %v2379_v25, %v645_v20  ;;  %vm685_vm15 = vcmp.eq.f32.partialorder %v2382_v27, %v645_v20  ;;  %862 = vmin.xlane.f32.xlu0 %v2523_v19  ;;  %v875_v16 = vshra.s32 %v2525_v38, 16  ;;  %v1098_v20 = vld [vmem:[#allocation5 + $0x90] sm:$0xff] }
 0x221   : > { %v716_v17 = vsel %vm684_vm14, %v2427_v22, 256  ;;  %v717_v42 = vsel %vm685_vm15, %v2430_v23, 256 }
 0x222   : > { %vm888_vm0 = vcmp.lt.s32.totalorder %v716_v17, %v717_v42  ;;  %v2533_v26 = vcvt.s32.f32 %v875_v16  ;;  %v1099_v16 = vld [vmem:[#allocation5 + $0x98] sm:$0xff] }
 0x223   : > { %v648_v28 = vpop.xlane.xlu1 %647  ;;  %v2535_v44 = vsel %vm888_vm0, %v716_v17, %v717_v42  ;;  %v1746_v17 = vpack.c.bf16 %v1081_v32, %v1080_v6  ;;  %v1748_v42 = vpack.c.bf16 %v1099_v16, %v1098_v20  ;;  %v1091_v32 = vld [vmem:[#allocation5 + $0x58] sm:$0xff]  ;;  %v1108_v20 = vld [vmem:[#allocation5 + $0xe0] sm:$0xff]  ;;  %v1109_v16 = vld [vmem:[#allocation5 + $0xe8] sm:$0xff] }
 0x224   : > { %vm686_vm1 = vcmp.eq.f32.partialorder %v2387_v36, %v648_v28  ;;  %vm687_vm2 = vcmp.eq.f32.partialorder %v2390_v37, %v648_v28  ;;  %878 = vmin.xlane.f32.xlu1 %v2533_v26  ;;  %v891_v25 = vshra.s32 %v2535_v44, 16  ;;  %v1082_v28 = vld [vmem:[#allocation5 + $0x10] sm:$0xff] }
 0x225   : > { %v718_v27 = vsel %vm686_vm1, %v2427_v22, 256  ;;  %v719_v50 = vsel %vm687_vm2, %v2430_v23, 256 }
 0x226   : > { %vm904_vm3 = vcmp.lt.s32.totalorder %v718_v27, %v719_v50  ;;  %v2543_v33 = vcvt.s32.f32 %v891_v25  ;;  %v1083_v25 = vld [vmem:[#allocation5 + $0x18] sm:$0xff] }
 0x227   : > { %v651_v34 = vpop.xlane.xlu0 %650  ;;  %v2545_v52 = vsel %vm904_vm3, %v718_v27, %v719_v50  ;;  %v1100_v27 = vld [vmem:[#allocation5 + $0xa0] sm:$0xff]  ;;  %v1101_v50 = vld [vmem:[#allocation5 + $0xa8] sm:$0xff] }
 0x228   : > { %vm688_vm4 = vcmp.eq.f32.partialorder %v2395_v45, %v651_v34  ;;  %vm689_vm5 = vcmp.eq.f32.partialorder %v2398_v46, %v651_v34  ;;  %894 = vmin.xlane.f32.xlu0 %v2543_v33  ;;  %v907_v36 = vshra.s32 %v2545_v52, 16  ;;  %v1750_v34 = vpack.c.bf16 %v1083_v25, %v1082_v28  ;;  %v1092_v28 = vld [vmem:[#allocation5 + $0x60] sm:$0xff]  ;;  %v1093_v25 = vld [vmem:[#allocation5 + $0x68] sm:$0xff] }
 0x229   : > { %v720_v37 = vsel %vm688_vm4, %v2427_v22, 256  ;;  %v721_v58 = vsel %vm689_vm5, %v2430_v23, 256 }
 0x22a   : > { %vm920_vm6 = vcmp.lt.s32.totalorder %v720_v37, %v721_v58  ;;  %v2553_v40 = vcvt.s32.f32 %v907_v36  ;;  %v1752_v36 = vpack.c.bf16 %v1101_v50, %v1100_v27  ;;  %v1770_v27 = vpack.c.bf16 %v1093_v25, %v1092_v28 }
 0x22b   : > { %v654_v41 = vpop.xlane.xlu1 %653  ;;  %v2555_v60 = vsel %vm920_vm6, %v720_v37, %v721_v58  ;;  %v1084_v37 = vld [vmem:[#allocation5 + $0x20] sm:$0xff]  ;;  %v1085_v58 = vld [vmem:[#allocation5 + $0x28] sm:$0xff]  ;;  %v730_v50 = vand.u32 65535, %v2436_v30 }
 0x22c   : > { %vm690_vm7 = vcmp.eq.f32.partialorder %v2403_v56, %v654_v41  ;;  %vm691_vm8 = vcmp.eq.f32.partialorder %v2406_v57, %v654_v41  ;;  %910 = vmin.xlane.f32.xlu1 %v2553_v40  ;;  %v923_v45 = vshra.s32 %v2555_v60, 16  ;;  %v1102_v41 = vld [vmem:[#allocation5 + $0xb0] sm:$0xff] }
 0x22d   : > { %v722_v46 = vsel %vm690_vm7, %v2427_v22, 256  ;;  %v723_v1 = vsel %vm691_vm8, %v2430_v23, 256 }
 0x22e   : > { %vm936_vm9 = vcmp.lt.s32.totalorder %v722_v46, %v723_v1  ;;  %v2563_v47 = vcvt.s32.f32 %v923_v45  ;;  %v1103_v45 = vld [vmem:[#allocation5 + $0xb8] sm:$0xff] }
 0x22f   : > { %v657_v48 = vpop.xlane.xlu0 %656  ;;  %v2565_v10 = vsel %vm936_vm9, %v722_v46, %v723_v1  ;;  %v1754_v46 = vpack.c.bf16 %v1085_v58, %v1084_v37  ;;  %v1756_v1 = vpack.c.bf16 %v1103_v45, %v1102_v41  ;;  %v746_v37 = vand.u32 65535, %v2445_v35 }
 0x230   : > { %vm692_vm10 = vcmp.eq.f32.partialorder %v2411_v3, %v657_v48  ;;  %vm693_vm11 = vcmp.eq.f32.partialorder %v2414_v4, %v657_v48  ;;  %926 = vmin.xlane.f32.xlu0 %v2563_v47  ;;  %v939_v56 = vshra.s32 %v2565_v10, 16  ;;  %v1086_v48 = vld [vmem:[#allocation5 + $0x30] sm:$0xff]  ;;  %v778_v35 = vand.u32 65535, %v2465_v51 }
 0x231   : > { %v724_v57 = vsel %vm692_vm10, %v2427_v22, 256  ;;  %v725_v12 = vsel %vm693_vm11, %v2430_v23, 256  ;;  %v748_v45 = vcvt.s32.f32 %v746_v37  ;;  %v810_v51 = vand.u32 65535, %v2485_v5 }
 0x232   : > { %vm952_vm12 = vcmp.lt.s32.totalorder %v724_v57, %v725_v12  ;;  %v2573_v54 = vcvt.s32.f32 %v939_v56  ;;  %v1087_v56 = vld [vmem:[#allocation5 + $0x38] sm:$0xff] }
 0x233   : > { %v660_v55 = vpop.xlane.xlu1 %659  ;;  %v2575_v21 = vsel %vm952_vm12, %v724_v57, %v725_v12  ;;  %v1104_v57 = vld [vmem:[#allocation5 + $0xc0] sm:$0xff]  ;;  %v1105_v12 = vld [vmem:[#allocation5 + $0xc8] sm:$0xff] }
 0x234   : > { %vm694_vm13 = vcmp.eq.f32.partialorder %v2419_v15, %v660_v55  ;;  %vm695_vm14 = vcmp.eq.f32.partialorder %v2422_v18, %v660_v55  ;;  %942 = vmin.xlane.f32.xlu1 %v2573_v54  ;;  %v955_v3 = vshra.s32 %v2575_v21, 16  ;;  %v1096_v18 = vld [vmem:[#allocation5 + $0x80] sm:$0xff]  ;;  %v1758_v55 = vpack.c.bf16 %v1087_v56, %v1086_v48 }
 0x235   : > { %v726_v4 = vsel %vm694_vm13, %v2427_v22, 256  ;;  %v727_v7 = vsel %vm695_vm14, %v2430_v23, 256  ;;  %v1744_v8 = vpack.c.bf16 %v1097_v31, %v1096_v18  ;;  %v1107_v18 = vld [vmem:[#allocation5 + $0xd8] sm:$0xff] }
 0x236   : > { %vm968_vm15 = vcmp.lt.s32.totalorder %v726_v4, %v727_v7  ;;  %v2583_v61 = vcvt.s32.f32 %v955_v3  ;;  %v1760_v3 = vpack.c.bf16 %v1105_v12, %v1104_v57  ;;  %v780_v57 = vcvt.s32.f32 %v778_v35 }
 0x237   : > { %v2585_v62 = vsel %vm968_vm15, %v726_v4, %v727_v7  ;;  %1745 = vmatprep.subr.bf16.mxu1 %v1744_v8  ;;  %v1088_v4 = vld [vmem:[#allocation5 + $0x40] sm:$0xff]  ;;  %v1089_v7 = vld [vmem:[#allocation5 + $0x48] sm:$0xff]  ;;  %v1090_v8 = vld [vmem:[#allocation5 + $0x50] sm:$0xff] }
 0x238   : > { %958 = vmin.xlane.f32.xlu0 %v2583_v61  ;;  %v971_v29 = vshra.s32 %v2585_v62, 16  ;;  %1747 = vmatpush3.bf16.msra.mxu1 %v1746_v17  ;;  %v1762_v31 = vpack.c.bf16 %v1089_v7, %v1088_v4  ;;  %v1766_v17 = vpack.c.bf16 %v1091_v32, %v1090_v8  ;;  %v1111_v4 = vld [vmem:[#allocation5 + $0xf8] sm:$0xff]  ;;  %v1094_v7 = vld [vmem:[#allocation5 + $0x70] sm:$0xff]  ;;  %v842_v32 = vand.u32 65535, %v2505_v9 }
 0x239   : > { %1749 = vmatprep.subr.bf16.mxu1 %v1748_v42  ;;  %v1768_v42 = vpack.c.bf16 %v1109_v16, %v1108_v20  ;;  %v874_v9 = vand.u32 65535, %v2525_v38  ;;  %v906_v38 = vand.u32 65535, %v2545_v52  ;;  %v938_v52 = vand.u32 65535, %v2565_v10 }
 0x23a   : > { %v2589_v15 = vcvt.s32.f32 %v971_v29  ;;  %v1106_v29 = vld [vmem:[#allocation5 + $0xd0] sm:$0xff]  ;;  %v970_v10 = vand.u32 65535, %v2585_v62 }
 0x23b   : > { %v1764_v6 = vpack.c.bf16 %v1107_v18, %v1106_v29  ;;  %v1095_v29 = vld [vmem:[#allocation5 + $0x78] sm:$0xff] }
 0x23c   : > { %974 = vmin.xlane.f32.xlu1 %v2589_v15  ;;  %1751 = vmatpush3.bf16.msra.mxu1 %v1750_v34 }
 0x23d   : > { %1753 = vmatprep.subr.bf16.mxu1 %v1752_v36  ;;  %v732_v36 = vcvt.s32.f32 %v730_v50 }
 0x240   : > { %1755 = vmatpush3.bf16.msra.mxu1 %v1754_v46  ;;  %v762_v46 = vand.u32 65535, %v2455_v43  ;;  %v794_v43 = vand.u32 65535, %v2475_v59  ;;  %v1774_v59 = vpack.c.bf16 %v1095_v29, %v1094_v7 }
 0x241   : > { %1757 = vmatprep.subr.bf16.mxu1 %v1756_v1 }
 0x242   : > { %v764_v48 = vcvt.s32.f32 %v762_v46 }
 0x244   : > { %1759 = vmatpush3.bf16.msra.mxu1 %v1758_v55  ;;  %v796_v55 = vcvt.s32.f32 %v794_v43  ;;  %v972_v43 = vcvt.s32.f32 %v970_v10 }
 0x245   : > { %1761 = vmatprep.subr.bf16.mxu1 %v1760_v3  ;;  %v1110_v3 = vld [vmem:[#allocation5 + $0xf0] sm:$0xff] }
 0x248   : > { %1763 = vmatpush3.bf16.msra.mxu1 %v1762_v31  ;;  %v812_v31 = vcvt.s32.f32 %v810_v51 }
 0x249   : > { %1765 = vmatprep.subr.bf16.mxu1 %v1764_v6  ;;  %v826_v6 = vand.u32 65535, %v2495_v13  ;;  %v858_v13 = vand.u32 65535, %v2515_v0  ;;  %v890_v0 = vand.u32 65535, %v2535_v44  ;;  %v922_v44 = vand.u32 65535, %v2555_v60 }
 0x24a   : > { %v954_v60 = vand.u32 65535, %v2575_v21 }
 0x24b   : > { %v860_v28 = vcvt.s32.f32 %v858_v13  ;;  %v924_v46 = vcvt.s32.f32 %v922_v44 }
 0x24c   : > { %1767 = vmatpush3.bf16.msra.mxu1 %v1766_v17  ;;  %v844_v17 = vcvt.s32.f32 %v842_v32 }
 0x24d   : > { %1769 = vmatprep.subr.bf16.mxu1 %v1768_v42 }
 0x250   : > { %1771 = vmatpush3.bf16.msra.mxu1 %v1770_v27  ;;  %v876_v27 = vcvt.s32.f32 %v874_v9 }
 0x28d   : > { %v2593_v34 = vpop.xlane.xlu0 %734 }
 0x28e   : > { %vm736_vm0 = vcmp.eq.f32.partialorder %v2443_v14, %v2593_v34 }
 0x28f   : > { %v737_v58 = vsel %vm736_vm0, %v732_v36, inf  ;;  %v892_v36 = vcvt.s32.f32 %v890_v0  ;;  %vm1273_vm0 = vcmask 7168  }
 0x290   : > { %738 = vmin.xlane.f32.xlu0 %v737_v58  ;;  %v908_v58 = vcvt.s32.f32 %v906_v38 }
 0x291   : > { %v2598_v41 = vpop.xlane.xlu1 %750 }
 0x292   : > { %vm752_vm1 = vcmp.eq.f32.partialorder %v2453_v39, %v2598_v41 }
 0x293   : > { %v753_v1 = vsel %vm752_vm1, %v748_v45, inf }
 0x294   : > { %754 = vmin.xlane.f32.xlu1 %v753_v1 }
 0x295   : > { %v2603_v30 = vpop.xlane.xlu0 %766 }
 0x296   : > { %vm768_vm2 = vcmp.eq.f32.partialorder %v2463_v49, %v2603_v30  ;;  %v1772_v49 = vpack.c.bf16 %v1111_v4, %v1110_v3  ;;  %v773_v51 = vcvt.f32.s32 %v2603_v30 }
 0x297   : > { %v769_v14 = vsel %vm768_vm2, %v764_v48, inf  ;;  %v940_v48 = vcvt.s32.f32 %v938_v52 }
 0x298   : > { %770 = vmin.xlane.f32.xlu0 %v769_v14  ;;  %1773 = vmatprep.subr.bf16.mxu1 %v1772_v49  ;;  %v956_v14 = vcvt.s32.f32 %v954_v60  ;;  %v774_v7 = vshll.u32 %v773_v51, 16 }
 0x299   : > { %v2608_v56 = vpop.xlane.xlu1 %782  ;;  %1775 = vmatpush3.bf16.msra.mxu1 %v1774_v59 }
 0x29a   : > { %vm784_vm3 = vcmp.eq.f32.partialorder %v2473_v53, %v2608_v56  ;;  %v789_v30 = vcvt.f32.s32 %v2608_v56 }
 0x29b   : > { %v785_v39 = vsel %vm784_vm3, %v780_v57, inf }
 0x29c   : > { %786 = vmin.xlane.f32.xlu1 %v785_v39  ;;  %v757_v39 = vcvt.f32.s32 %v2598_v41  ;;  %v2033_v41 = vmov 1.0  }
 0x29d   : > { %v2613_v12 = vpop.xlane.xlu0 %798 }
 0x29e   : > { %vm800_vm4 = vcmp.eq.f32.partialorder %v2483_v63, %v2613_v12  ;;  %v828_v63 = vcvt.s32.f32 %v826_v6 }
 0x29f   : > { %v801_v18 = vsel %vm800_vm4, %v796_v55, inf }
 0x2a0   : > { %802 = vmin.xlane.f32.xlu0 %v801_v18 }
 0x2a1   : > { %v2618_v53 = vpop.xlane.xlu1 %814 }
 0x2a2   : > { %vm816_vm5 = vcmp.eq.f32.partialorder %v2493_v11, %v2618_v53 }
 0x2a3   : > { %v817_v5 = vsel %vm816_vm5, %v812_v31, inf  ;;  %v805_v31 = vcvt.f32.s32 %v2613_v12 }
 0x2a4   : > { %818 = vmin.xlane.f32.xlu1 %v817_v5  ;;  %v790_v5 = vshll.u32 %v789_v30, 16 }
 0x2a5   : > { %v2623_v8 = vpop.xlane.xlu0 %830  ;;  %v806_v32 = vshll.u32 %v805_v31, 16 }
 0x2a6   : > { %vm832_vm6 = vcmp.eq.f32.partialorder %v2503_v24, %v2623_v8 }
 0x2a7   : > { %v833_v20 = vsel %vm832_vm6, %v828_v63, inf }
 0x2a8   : > { %834 = vmin.xlane.f32.xlu0 %v833_v20 }
 0x2a9   : > { %v2628_v16 = vpop.xlane.xlu1 %846 }
 0x2aa   : > { %vm848_vm7 = vcmp.eq.f32.partialorder %v2513_v2, %v2628_v16 }
 0x2ab   : > { %v849_v11 = vsel %vm848_vm7, %v844_v17, inf  ;;  %v821_v17 = vcvt.f32.s32 %v2618_v53 }
 0x2ac   : > { %850 = vmin.xlane.f32.xlu1 %v849_v11  ;;  %v837_v11 = vcvt.f32.s32 %v2623_v8 }
 0x2ad   : > { %v2633_v42 = vpop.xlane.xlu0 %862  ;;  %v822_v9 = vshll.u32 %v821_v17, 16  ;;  %v1851_v17 = vld [vmem:[%s2248_s30] sm:$0xff] }
 0x2ae   : > { %vm864_vm8 = vcmp.eq.f32.partialorder %v2523_v19, %v2633_v42  ;;  %v869_v38 = vcvt.f32.s32 %v2633_v42 }
 0x2af   : > { %v865_v24 = vsel %vm864_vm8, %v860_v28, inf }
 0x2b0   : > { %866 = vmin.xlane.f32.xlu0 %v865_v24 }
 0x2b1   : > { %v2638_v25 = vpop.xlane.xlu1 %878 }
 0x2b2   : > { %vm880_vm9 = vcmp.eq.f32.partialorder %v2533_v26, %v2638_v25  ;;  %v885_v52 = vcvt.f32.s32 %v2638_v25 }
 0x2b3   : > { %v881_v2 = vsel %vm880_vm9, %v876_v27, inf  ;;  %v838_v27 = vshll.u32 %v837_v11, 16  ;;  %v1852_v11 = vld [vmem:[%s2248_s30 + $0x8] sm:$0xff] }
 0x2b4   : > { %882 = vmin.xlane.f32.xlu1 %v881_v2  ;;  %v853_v2 = vcvt.f32.s32 %v2628_v16 }
 0x2b5   : > { %v2643_v50 = vpop.xlane.xlu0 %894 }
 0x2b6   : > { %vm896_vm10 = vcmp.eq.f32.partialorder %v2543_v33, %v2643_v50 }
 0x2b7   : > { %v897_v19 = vsel %vm896_vm10, %v892_v36, inf }
 0x2b8   : > { %898 = vmin.xlane.f32.xlu0 %v897_v19 }
 0x2b9   : > { %v2648_v37 = vpop.xlane.xlu1 %910 }
 0x2ba   : > { %vm912_vm11 = vcmp.eq.f32.partialorder %v2553_v40, %v2648_v37 }
 0x2bb   : > { %v913_v26 = vsel %vm912_vm11, %v908_v58, inf  ;;  %v854_v58 = vshll.u32 %v853_v2, 16 }
 0x2bc   : > { %914 = vmin.xlane.f32.xlu1 %v913_v26  ;;  %v870_v26 = vshll.u32 %v869_v38, 16 }
 0x2bd   : > { %v2653_v45 = vpop.xlane.xlu0 %926 }
 0x2be   : > { %vm928_vm12 = vcmp.eq.f32.partialorder %v2563_v47, %v2653_v45 }
 0x2bf   : > { %v929_v33 = vsel %vm928_vm12, %v924_v46, inf }
 0x2c0   : > { %930 = vmin.xlane.f32.xlu0 %v929_v33 }
 0x2c1   : > { %v2658_v1 = vpop.xlane.xlu1 %942 }
 0x2c2   : > { %vm944_vm13 = vcmp.eq.f32.partialorder %v2573_v54, %v2658_v1  ;;  %v741_v54 = vcvt.f32.s32 %v2593_v34  ;;  %v758_v34 = vshll.u32 %v757_v39, 16  ;;  %v949_v51 = vcvt.f32.s32 %v2658_v1 }
 0x2c3   : > { %v945_v40 = vsel %vm944_vm13, %v940_v48, inf  ;;  %v901_v48 = vcvt.f32.s32 %v2643_v50 }
 0x2c4   : > { %946 = vmin.xlane.f32.xlu1 %v945_v40  ;;  %v742_v62 = vshll.u32 %v741_v54, 16  ;;  %v886_v40 = vshll.u32 %v885_v52, 16  ;;  %v933_v54 = vcvt.f32.s32 %v2653_v45 }
 0x2c5   : > { %v2663_v35 = vpop.xlane.xlu0 %958  ;;  %v902_v10 = vshll.u32 %v901_v48, 16 }
 0x2c6   : > { %vm960_vm14 = vcmp.eq.f32.partialorder %v2583_v61, %v2663_v35 }
 0x2c7   : > { %v961_v47 = vsel %vm960_vm14, %v956_v14, inf }
 0x2c8   : > { %962 = vmin.xlane.f32.xlu0 %v961_v47 }
 0x2c9   : > { %v2668_v57 = vpop.xlane.xlu1 %974 }
 0x2ca   : > { %vm976_vm15 = vcmp.eq.f32.partialorder %v2589_v15, %v2668_v57 }
 0x2cb   : > { %v977_v21 = vsel %vm976_vm15, %v972_v43, inf  ;;  %v917_v43 = vcvt.f32.s32 %v2648_v37 }
 0x2cc   : > { %978 = vmin.xlane.f32.xlu1 %v977_v21 }
 0x31d   : > { %v739_v61 = vpop.xlane.xlu0 %738 }
 0x31e   : > { %v740_v55 = vcvt.f32.s32 %v739_v61 }
 0x320   : > { %v743_v15 = vadd.s32 %v742_v62, %v740_v55  ;;  %v918_v62 = vshll.u32 %v917_v43, 16  ;;  %v934_v55 = vshll.u32 %v933_v54, 16  ;;  %v1857_v54 = vld [vmem:[%s2248_s30 + $0x30] sm:$0xff] }
 0x321   : > { %v755_v3 = vpop.xlane.xlu1 %754 }
 0x322   : > { %1274 = vst.msk [vmem:[%s2683_s11] sm:$0xff] %vm1273_vm0, %v743_v15  ;;  %v756_v4 = vcvt.f32.s32 %v755_v3  ;;  %vm985_vm1 = vcmp.eq.s32.totalorder %v2430_v23, %v743_v15  ;;  %vm984_vm2 = vcmp.eq.s32.totalorder %v2427_v22, %v743_v15 }
 0x323   : > { %1593 = vmatprep.mubr.msk.f32.mxu1 %vm985_vm1, %v2033_v41 }
 0x324   : > { %v759_v49 = vadd.s32 %v758_v34, %v756_v4  ;;  %1594 = vmatmul.mubr.msk.f32.vlgmr.msra.gmra.mrb[0].mxu1 %vm984_vm2, %v2033_v41  ;;  %v965_v34 = vcvt.f32.s32 %v2663_v35 }
 0x325   : > { %v771_v29 = vpop.xlane.xlu0 %770 }
 0x326   : > { %1275 = vst.msk [vmem:[%s2683_s11 + $0x8] sm:$0xff] %vm1273_vm0, %v759_v49  ;;  %v772_v18 = vcvt.f32.s32 %v771_v29  ;;  %vm987_vm3 = vcmp.eq.s32.totalorder %v2430_v23, %v759_v49  ;;  %vm986_vm4 = vcmp.eq.s32.totalorder %v2427_v22, %v759_v49  ;;  %v950_v49 = vshll.u32 %v949_v51, 16 }
 0x327   : > { %1595 = vmatprep.mubr.msk.f32.mxu1 %vm987_vm3, %v2033_v41  ;;  %v966_v29 = vshll.u32 %v965_v34, 16 }
 0x328   : > { %v775_v59 = vadd.s32 %v774_v7, %v772_v18  ;;  %1596 = vmatmul.mubr.msk.f32.gmra.mrb[2].mxu1 %vm986_vm4, %v2033_v41  ;;  %v981_v18 = vcvt.f32.s32 %v2668_v57 }
 0x329   : > { %v787_v6 = vpop.xlane.xlu1 %786 }
 0x32a   : > { %1276 = vst.msk [vmem:[%s2683_s11 + $0x10] sm:$0xff] %vm1273_vm0, %v775_v59  ;;  %v788_v56 = vcvt.f32.s32 %v787_v6  ;;  %vm989_vm5 = vcmp.eq.s32.totalorder %v2430_v23, %v775_v59  ;;  %vm988_vm6 = vcmp.eq.s32.totalorder %v2427_v22, %v775_v59  ;;  %v982_v6 = vshll.u32 %v981_v18, 16 }
 0x32b   : > { %1597 = vmatprep.mubr.msk.f32.mxu1 %vm989_vm5, %v2033_v41 }
 0x32c   : > { %v791_v63 = vadd.s32 %v790_v5, %v788_v56  ;;  %1598 = vmatmul.mubr.msk.f32.gmra.mrb[4].mxu1 %vm988_vm6, %v2033_v41 }
 0x32d   : > { %v803_v20 = vpop.xlane.xlu0 %802 }
 0x32e   : > { %1277 = vst.msk [vmem:[%s2683_s11 + $0x18] sm:$0xff] %vm1273_vm0, %v791_v63  ;;  %v804_v12 = vcvt.f32.s32 %v803_v20  ;;  %vm991_vm7 = vcmp.eq.s32.totalorder %v2430_v23, %v791_v63  ;;  %vm990_vm8 = vcmp.eq.s32.totalorder %v2427_v22, %v791_v63 }
 0x32f   : > { %1599 = vmatprep.mubr.msk.f32.mxu1 %vm991_vm7, %v2033_v41 }
 0x330   : > { %v807_v13 = vadd.s32 %v806_v32, %v804_v12  ;;  %1600 = vmatmul.mubr.msk.f32.gmra.mrb[6].mxu1 %vm990_vm8, %v2033_v41 }
 0x331   : > { %v819_v28 = vpop.xlane.xlu1 %818 }
 0x332   : > { %1278 = vst.msk [vmem:[%s2683_s11 + $0x20] sm:$0xff] %vm1273_vm0, %v807_v13  ;;  %v820_v53 = vcvt.f32.s32 %v819_v28  ;;  %vm993_vm9 = vcmp.eq.s32.totalorder %v2430_v23, %v807_v13  ;;  %vm992_vm10 = vcmp.eq.s32.totalorder %v2427_v22, %v807_v13 }
 0x333   : > { %1601 = vmatprep.mubr.msk.f32.mxu1 %vm993_vm9, %v2033_v41 }
 0x334   : > { %v823_v24 = vadd.s32 %v822_v9, %v820_v53  ;;  %1602 = vmatmul.mubr.msk.f32.gmra.mrb[8].mxu1 %vm992_vm10, %v2033_v41 }
 0x335   : > { %v835_v0 = vpop.xlane.xlu0 %834 }
 0x336   : > { %1279 = vst.msk [vmem:[%s2683_s11 + $0x28] sm:$0xff] %vm1273_vm0, %v823_v24  ;;  %v836_v8 = vcvt.f32.s32 %v835_v0  ;;  %vm995_vm11 = vcmp.eq.s32.totalorder %v2430_v23, %v823_v24  ;;  %vm994_vm12 = vcmp.eq.s32.totalorder %v2427_v22, %v823_v24  ;;  %v1853_v0 = vld [vmem:[%s2248_s30 + $0x10] sm:$0xff] }
 0x337   : > { %1603 = vmatprep.mubr.msk.f32.mxu1 %vm995_vm11, %v2033_v41 }
 0x338   : > { %v839_v36 = vadd.s32 %v838_v27, %v836_v8  ;;  %1604 = vmatmul.mubr.msk.f32.gmra.mrb[10].mxu1 %vm994_vm12, %v2033_v41 }
 0x339   : > { %v851_v19 = vpop.xlane.xlu1 %850 }
 0x33a   : > { %1280 = vst.msk [vmem:[%s2683_s11 + $0x30] sm:$0xff] %vm1273_vm0, %v839_v36  ;;  %v852_v16 = vcvt.f32.s32 %v851_v19  ;;  %vm997_vm13 = vcmp.eq.s32.totalorder %v2430_v23, %v839_v36  ;;  %vm996_vm14 = vcmp.eq.s32.totalorder %v2427_v22, %v839_v36 }
 0x33b   : > { %1605 = vmatprep.mubr.msk.f32.mxu1 %vm997_vm13, %v2033_v41 }
 0x33c   : > { %v855_v44 = vadd.s32 %v854_v58, %v852_v16  ;;  %1606 = vmatmul.mubr.msk.f32.gmra.mrb[12].mxu1 %vm996_vm14, %v2033_v41  ;;  %v1854_v58 = vld [vmem:[%s2248_s30 + $0x18] sm:$0xff] }
 0x33d   : > { %v867_v46 = vpop.xlane.xlu0 %866 }
 0x33e   : > { %1281 = vst.msk [vmem:[%s2683_s11 + $0x38] sm:$0xff] %vm1273_vm0, %v855_v44  ;;  %v868_v42 = vcvt.f32.s32 %v867_v46  ;;  %vm999_vm15 = vcmp.eq.s32.totalorder %v2430_v23, %v855_v44  ;;  %vm998_vm1 = vcmp.eq.s32.totalorder %v2427_v22, %v855_v44 }
 0x33f   : > { %1607 = vmatprep.mubr.msk.f32.mxu1 %vm999_vm15, %v2033_v41 }
 0x340   : > { %v871_v33 = vadd.s32 %v870_v26, %v868_v42  ;;  %1608 = vmatmul.mubr.msk.f32.gmra.mrb[14].mxu1 %vm998_vm1, %v2033_v41  ;;  %v1855_v42 = vld [vmem:[%s2248_s30 + $0x20] sm:$0xff] }
 0x341   : > { %v883_v60 = vpop.xlane.xlu1 %882 }
 0x342   : > { %1282 = vst.msk [vmem:[%s2683_s11 + $0x40] sm:$0xff] %vm1273_vm0, %v871_v33  ;;  %v884_v25 = vcvt.f32.s32 %v883_v60  ;;  %vm1001_vm2 = vcmp.eq.s32.totalorder %v2430_v23, %v871_v33  ;;  %vm1000_vm3 = vcmp.eq.s32.totalorder %v2427_v22, %v871_v33 }
 0x343   : > { %1609 = vmatprep.mubr.msk.f32.mxu1 %vm1001_vm2, %v2033_v41 }
 0x344   : > { %v887_v14 = vadd.s32 %v886_v40, %v884_v25  ;;  %1610 = vmatmul.mubr.msk.f32.gmra.mrb[16].mxu1 %vm1000_vm3, %v2033_v41 }
 0x345   : > { %v899_v47 = vpop.xlane.xlu0 %898 }
 0x346   : > { %1283 = vst.msk [vmem:[%s2683_s11 + $0x48] sm:$0xff] %vm1273_vm0, %v887_v14  ;;  %v900_v50 = vcvt.f32.s32 %v899_v47  ;;  %vm1003_vm4 = vcmp.eq.s32.totalorder %v2430_v23, %v887_v14  ;;  %vm1002_vm5 = vcmp.eq.s32.totalorder %v2427_v22, %v887_v14  ;;  %v1856_v14 = vld [vmem:[%s2248_s30 + $0x28] sm:$0xff] }
 0x347   : > { %1611 = vmatprep.mubr.msk.f32.mxu1 %vm1003_vm4, %v2033_v41 }
 0x348   : > { %v903_v21 = vadd.s32 %v902_v10, %v900_v50  ;;  %1612 = vmatmul.mubr.msk.f32.gmra.mrb[18].mxu1 %vm1002_vm5, %v2033_v41 }
 0x349   : > { %v915_v61 = vpop.xlane.xlu1 %914 }
 0x34a   : > { %1284 = vst.msk [vmem:[%s2683_s11 + $0x50] sm:$0xff] %vm1273_vm0, %v903_v21  ;;  %v916_v37 = vcvt.f32.s32 %v915_v61  ;;  %vm1005_vm6 = vcmp.eq.s32.totalorder %v2430_v23, %v903_v21  ;;  %vm1004_vm7 = vcmp.eq.s32.totalorder %v2427_v22, %v903_v21 }
 0x34b   : > { %1613 = vmatprep.mubr.msk.f32.mxu1 %vm1005_vm6, %v2033_v41 }
 0x34c   : > { %v919_v39 = vadd.s32 %v918_v62, %v916_v37  ;;  %1614 = vmatmul.mubr.msk.f32.gmra.mrb[20].mxu1 %vm1004_vm7, %v2033_v41 }
 0x34d   : > { %v931_v15 = vpop.xlane.xlu0 %930 }
 0x34e   : > { %1285 = vst.msk [vmem:[%s2683_s11 + $0x58] sm:$0xff] %vm1273_vm0, %v919_v39  ;;  %v932_v45 = vcvt.f32.s32 %v931_v15  ;;  %vm1007_vm8 = vcmp.eq.s32.totalorder %v2430_v23, %v919_v39  ;;  %vm1006_vm9 = vcmp.eq.s32.totalorder %v2427_v22, %v919_v39  ;;  %v1858_v15 = vld [vmem:[%s2248_s30 + $0x38] sm:$0xff] }
 0x34f   : > { %1615 = vmatprep.mubr.msk.f32.mxu1 %vm1007_vm8, %v2033_v41 }
 0x350   : > { %v935_v3 = vadd.s32 %v934_v55, %v932_v45  ;;  %1616 = vmatmul.mubr.msk.f32.gmra.mrb[22].mxu1 %vm1006_vm9, %v2033_v41 }
 0x351   : > { %v947_v4 = vpop.xlane.xlu1 %946 }
 0x352   : > { %1286 = vst.msk [vmem:[%s2683_s11 + $0x60] sm:$0xff] %vm1273_vm0, %v935_v3  ;;  %v948_v1 = vcvt.f32.s32 %v947_v4  ;;  %vm1009_vm10 = vcmp.eq.s32.totalorder %v2430_v23, %v935_v3  ;;  %vm1008_vm11 = vcmp.eq.s32.totalorder %v2427_v22, %v935_v3 }
 0x353   : > { %1617 = vmatprep.mubr.msk.f32.mxu1 %vm1009_vm10, %v2033_v41 }
 0x354   : > { %v951_v7 = vadd.s32 %v950_v49, %v948_v1  ;;  %1618 = vmatmul.mubr.msk.f32.gmra.mrb[24].mxu1 %vm1008_vm11, %v2033_v41  ;;  %v1859_v49 = vld [vmem:[%s2248_s30 + $0x40] sm:$0xff] }
 0x355   : > { %v963_v30 = vpop.xlane.xlu0 %962 }
 0x356   : > { %1287 = vst.msk [vmem:[%s2683_s11 + $0x68] sm:$0xff] %vm1273_vm0, %v951_v7  ;;  %v964_v35 = vcvt.f32.s32 %v963_v30  ;;  %vm1011_vm12 = vcmp.eq.s32.totalorder %v2430_v23, %v951_v7  ;;  %vm1010_vm13 = vcmp.eq.s32.totalorder %v2427_v22, %v951_v7 }
 0x357   : > { %1619 = vmatprep.mubr.msk.f32.mxu1 %vm1011_vm12, %v2033_v41 }
 0x358   : > { %v967_v59 = vadd.s32 %v966_v29, %v964_v35  ;;  %1620 = vmatmul.mubr.msk.f32.gmra.mrb[26].mxu1 %vm1010_vm13, %v2033_v41  ;;  %v1860_v35 = vld [vmem:[%s2248_s30 + $0x48] sm:$0xff] }
 0x359   : > { %v979_v31 = vpop.xlane.xlu1 %978 }
 0x35a   : > { %1288 = vst.msk [vmem:[%s2683_s11 + $0x70] sm:$0xff] %vm1273_vm0, %v967_v59  ;;  %v980_v5 = vcvt.f32.s32 %v979_v31  ;;  %vm1013_vm14 = vcmp.eq.s32.totalorder %v2430_v23, %v967_v59  ;;  %vm1012_vm15 = vcmp.eq.s32.totalorder %v2427_v22, %v967_v59 }
 0x35b   : > { %1621 = vmatprep.mubr.msk.f32.mxu1 %vm1013_vm14, %v2033_v41 }
 0x35c   : > { %v983_v57 = vadd.s32 %v982_v6, %v980_v5  ;;  %1622 = vmatmul.mubr.msk.f32.gmra.mrb[28].mxu1 %vm1012_vm15, %v2033_v41 }
 0x35e   : > { %1289 = vst.msk [vmem:[%s2683_s11 + $0x78] sm:$0xff] %vm1273_vm0, %v983_v57  ;;  %vm1015_vm1 = vcmp.eq.s32.totalorder %v2430_v23, %v983_v57  ;;  %vm1014_vm2 = vcmp.eq.s32.totalorder %v2427_v22, %v983_v57 }
 0x35f   : > { %1623 = vmatprep.mubr.msk.f32.mxu1 %vm1015_vm1, %v2033_v41 }
 0x360   : > { %1624 = vmatmul.mubr.msk.f32.gmra.mrb[30].mxu1 %vm1014_vm2, %v2033_v41 }
 0x3f7   : > { %v1664_v56 = vpop.f32.mrb[0].mxu1 }
 0x3f8   : > { %v1665_v63 = vpop.f32.mrb[1].mxu1 }
 0x3f9   : > { %v1666_v32 = vadd.f32 %v1665_v63, %v1664_v56  ;;  %v1861_v56 = vld [vmem:[%s2248_s30 + $0x50] sm:$0xff] }
 0x3fb   : > { %1257 = vst [vmem:[%s2797_s8] sm:$0xff] %v1666_v32  ;;  %v1667_v20 = vpop.f32.mrb[2].mxu1  ;;  %v1290_v23 = vsub.f32 %v1666_v32, %v1851_v17 }
 0x3fc   : > { %v1668_v22 = vpop.f32.mrb[3].mxu1 }
 0x3fd   : > { %v1669_v12 = vadd.f32 %v1668_v22, %v1667_v20  ;;  %v1306_v13 = vmul.f32 %v1290_v23, %v1290_v23  ;;  %v1862_v22 = vld [vmem:[%s2248_s30 + $0x58] sm:$0xff] }
 0x3ff   : > { %1258 = vst [vmem:[%s2797_s8 + $0x8] sm:$0xff] %v1669_v12  ;;  %1322 = vadd.xlane.f32.xlu0 %v1306_v13  ;;  %v1670_v41 = vpop.f32.mrb[4].mxu1  ;;  %v1291_v28 = vsub.f32 %v1669_v12, %v1852_v11 }
 0x400   : > { %v1671_v9 = vpop.f32.mrb[5].mxu1 }
 0x401   : > { %v1672_v53 = vadd.f32 %v1671_v9, %v1670_v41  ;;  %v1307_v24 = vmul.f32 %v1291_v28, %v1291_v28  ;;  %v1863_v9 = vld [vmem:[%s2248_s30 + $0x60] sm:$0xff] }
 0x403   : > { %1259 = vst [vmem:[%s2797_s8 + $0x10] sm:$0xff] %v1672_v53  ;;  %1324 = vadd.xlane.f32.xlu1 %v1307_v24  ;;  %v1673_v27 = vpop.f32.mrb[6].mxu1  ;;  %v1292_v2 = vsub.f32 %v1672_v53, %v1853_v0 }
 0x404   : > { %v1674_v8 = vpop.f32.mrb[7].mxu1 }
 0x405   : > { %v1675_v36 = vadd.f32 %v1674_v8, %v1673_v27  ;;  %v1308_v38 = vmul.f32 %v1292_v2, %v1292_v2  ;;  %v1864_v8 = vld [vmem:[%s2248_s30 + $0x68] sm:$0xff] }
 0x407   : > { %1260 = vst [vmem:[%s2797_s8 + $0x18] sm:$0xff] %v1675_v36  ;;  %1326 = vadd.xlane.f32.xlu0 %v1308_v38  ;;  %v1676_v19 = vpop.f32.mrb[8].mxu1  ;;  %v1293_v16 = vsub.f32 %v1675_v36, %v1854_v58 }
 0x408   : > { %v1677_v44 = vpop.f32.mrb[9].mxu1 }
 0x409   : > { %v1678_v26 = vadd.f32 %v1677_v44, %v1676_v19  ;;  %v1309_v46 = vmul.f32 %v1293_v16, %v1293_v16  ;;  %v1865_v44 = vld [vmem:[%s2248_s30 + $0x70] sm:$0xff] }
 0x40b   : > { %1261 = vst [vmem:[%s2797_s8 + $0x20] sm:$0xff] %v1678_v26  ;;  %1328 = vadd.xlane.f32.xlu1 %v1309_v46  ;;  %v1679_v52 = vpop.f32.mrb[10].mxu1  ;;  %v1294_v33 = vsub.f32 %v1678_v26, %v1855_v42 }
 0x40c   : > { %v1680_v48 = vpop.f32.mrb[11].mxu1 }
 0x40d   : > { %v1681_v60 = vadd.f32 %v1680_v48, %v1679_v52  ;;  %v1310_v40 = vmul.f32 %v1294_v33, %v1294_v33  ;;  %v1866_v33 = vld [vmem:[%s2248_s30 + $0x78] sm:$0xff]  ;;  %s2034_s30 = smov [#allocation8]  }
 0x40e   : > { %s1957_s17 = sshll.u32 %s2034_s30, 4  ;;  %s1958_s17 = int_to_ptr.vmem [resolvable:$false] %s1957_s17 }
 0x40f   : > { %1262 = vst [vmem:[%s2797_s8 + $0x28] sm:$0xff] %v1681_v60  ;;  %1330 = vadd.xlane.f32.xlu0 %v1310_v40  ;;  %v1682_v25 = vpop.f32.mrb[12].mxu1  ;;  %v1295_v10 = vsub.f32 %v1681_v60, %v1856_v14  ;;  %s1959_s25 = scalar_lea.vmem %s1958_s17, 4096  ;;  %p1960_p13 = scmp.lt.s32.totalorder %s2838_s10, %s1958_s17 }
 0x410   : > { %v1683_v47 = vpop.f32.mrb[13].mxu1  ;;  %p1961_p3 = scmp.lt.s32.totalorder %s1959_s25, %s1953_s29 }
 0x411   : > { %v1684_v43 = vadd.f32 %v1683_v47, %v1682_v25  ;;  %v1311_v50 = vmul.f32 %v1295_v10, %v1295_v10 }
 0x412   : > { %p1962_p7 = por %p1961_p3, %p1960_p13 }
 0x413   : > { %1263 = vst [vmem:[%s2797_s8 + $0x30] sm:$0xff] %v1684_v43  ;;  %1332 = vadd.xlane.f32.xlu1 %v1311_v50  ;;  %v1685_v21 = vpop.f32.mrb[14].mxu1  ;;  %v1296_v61 = vsub.f32 %v1684_v43, %v1857_v54 }
 0x414   : > { %v1686_v62 = vpop.f32.mrb[15].mxu1  ;;  %p1963_p9 = pnand %p1962_p7, %p1956_p11 }
 0x415   : > { %v1687_v37 = vadd.f32 %v1686_v62, %v1685_v21  ;;  %v1312_v39 = vmul.f32 %v1296_v61, %v1296_v61 }
 0x417   : > { %1264 = vst [vmem:[%s2797_s8 + $0x38] sm:$0xff] %v1687_v37  ;;  %1334 = vadd.xlane.f32.xlu0 %v1312_v39  ;;  %v1688_v55 = vpop.f32.mrb[16].mxu1  ;;  %v1297_v51 = vsub.f32 %v1687_v37, %v1858_v15 }
 0x418   : > { %v1689_v45 = vpop.f32.mrb[17].mxu1 }
 0x419   : > { %v1690_v3 = vadd.f32 %v1689_v45, %v1688_v55  ;;  %v1313_v34 = vmul.f32 %v1297_v51, %v1297_v51 }
 0x41b   : > { %1265 = vst [vmem:[%s2797_s8 + $0x40] sm:$0xff] %v1690_v3  ;;  %1336 = vadd.xlane.f32.xlu1 %v1313_v34  ;;  %v1691_v4 = vpop.f32.mrb[18].mxu1  ;;  %v1298_v1 = vsub.f32 %v1690_v3, %v1859_v49 }
 0x41c   : > { %v1692_v7 = vpop.f32.mrb[19].mxu1 }
 0x41d   : > { %v1693_v29 = vadd.f32 %v1692_v7, %v1691_v4  ;;  %v1314_v30 = vmul.f32 %v1298_v1, %v1298_v1 }
 0x41f   : > { %1266 = vst [vmem:[%s2797_s8 + $0x48] sm:$0xff] %v1693_v29  ;;  %1338 = vadd.xlane.f32.xlu0 %v1314_v30  ;;  %v1694_v18 = vpop.f32.mrb[20].mxu1  ;;  %v1299_v59 = vsub.f32 %v1693_v29, %v1860_v35 }
 0x420   : > { %v1695_v31 = vpop.f32.mrb[21].mxu1 }
 0x421   : > { %v1696_v6 = vadd.f32 %v1695_v31, %v1694_v18  ;;  %v1315_v5 = vmul.f32 %v1299_v59, %v1299_v59 }
 0x423   : > { %1267 = vst [vmem:[%s2797_s8 + $0x50] sm:$0xff] %v1696_v6  ;;  %1340 = vadd.xlane.f32.xlu1 %v1315_v5  ;;  %v1697_v57 = vpop.f32.mrb[22].mxu1  ;;  %v1300_v63 = vsub.f32 %v1696_v6, %v1861_v56 }
 0x424   : > { %v1698_v32 = vpop.f32.mrb[23].mxu1 }
 0x425   : > { %v1699_v20 = vadd.f32 %v1698_v32, %v1697_v57  ;;  %v1316_v17 = vmul.f32 %v1300_v63, %v1300_v63 }
 0x427   : > { %1268 = vst [vmem:[%s2797_s8 + $0x58] sm:$0xff] %v1699_v20  ;;  %1342 = vadd.xlane.f32.xlu0 %v1316_v17  ;;  %v1700_v23 = vpop.f32.mrb[24].mxu1  ;;  %v1301_v12 = vsub.f32 %v1699_v20, %v1862_v22 }
 0x428   : > { %v1701_v13 = vpop.f32.mrb[25].mxu1 }
 0x429   : > { %v1702_v41 = vadd.f32 %v1701_v13, %v1700_v23  ;;  %v1317_v11 = vmul.f32 %v1301_v12, %v1301_v12 }
 0x42b   : > { %1269 = vst [vmem:[%s2797_s8 + $0x60] sm:$0xff] %v1702_v41  ;;  %1344 = vadd.xlane.f32.xlu1 %v1317_v11  ;;  %v1703_v28 = vpop.f32.mrb[26].mxu1  ;;  %v1302_v53 = vsub.f32 %v1702_v41, %v1863_v9 }
 0x42c   : > { %v1704_v24 = vpop.f32.mrb[27].mxu1 }
 0x42d   : > { %v1705_v27 = vadd.f32 %v1704_v24, %v1703_v28  ;;  %v1318_v0 = vmul.f32 %v1302_v53, %v1302_v53 }
 0x42f   : > { %1270 = vst [vmem:[%s2797_s8 + $0x68] sm:$0xff] %v1705_v27  ;;  %1346 = vadd.xlane.f32.xlu0 %v1318_v0  ;;  %v1706_v2 = vpop.f32.mrb[28].mxu1  ;;  %v1303_v36 = vsub.f32 %v1705_v27, %v1864_v8 }
 0x430   : > { %v1707_v38 = vpop.f32.mrb[29].mxu1 }
 0x431   : > { %v1708_v19 = vadd.f32 %v1707_v38, %v1706_v2  ;;  %v1319_v58 = vmul.f32 %v1303_v36, %v1303_v36 }
 0x433   : > { %1271 = vst [vmem:[%s2797_s8 + $0x70] sm:$0xff] %v1708_v19  ;;  %1348 = vadd.xlane.f32.xlu1 %v1319_v58  ;;  %v1709_v16 = vpop.f32.mrb[30].mxu1  ;;  %v1304_v26 = vsub.f32 %v1708_v19, %v1865_v44 }
 0x434   : > { %v1710_v46 = vpop.f32.mrb[31].mxu1 }
 0x435   : > { %v1711_v52 = vadd.f32 %v1710_v46, %v1709_v16  ;;  %v1320_v42 = vmul.f32 %v1304_v26, %v1304_v26 }
 0x437   : > { %1272 = vst [vmem:[%s2797_s8 + $0x78] sm:$0xff] %v1711_v52  ;;  %1350 = vadd.xlane.f32.xlu0 %v1320_v42  ;;  %v1305_v48 = vsub.f32 %v1711_v52, %v1866_v33 }
 0x439   : > { %v1321_v60 = vmul.f32 %v1305_v48, %v1305_v48 }
 0x43b   : > { %1352 = vadd.xlane.f32.xlu1 %v1321_v60 }
 0x43c   : > { %1966 = shalt.err (!%p1963_p9)
}
 0x43d   : > { %s1967_s26 = scalar_lea.hbm %s2836_s18, 2048  ;;  %s1971_s15 = scalar_lea.hbm %s2924_s4, 8192 }
 0x43e   : > { %p1968_p12 = scmp.ne.s32.totalorder %s2836_s18, %s1967_s26  ;;  %p1972_p10 = scmp.lt.u32.totalorder %s2836_s18, %s2924_s4 }
 0x43f   : > { %p1973_p1 = scmp.lt.u32.totalorder %s1971_s15, %s1967_s26  ;;  %p1975_p4 = scmp.lt.u32.totalorder %s1967_s26, %s2836_s18 }
 0x440   : > { %p1969_p0 = pnand %p1968_p12, %p2190_p8 }
 0x441   : > { %p1974_p2 = por %p1973_p1, %p1972_p10 }
 0x442   : > { %p1970_p5 = pneg %p1969_p0 }
 0x443   : > { %p1976_p6 = por %p1975_p4, %p1974_p2 }
 0x445   : > { %p1977_p11 = pnand %p1976_p6, %p1970_p5 }
 0x447   : > { %1980 = shalt.err (!%p1977_p11)
}
 0x448   : > { %s2035_s29 = smov 128   ;;  %s2036_s30 = smov 8  }
 0x449   : > { %1786 = dma.vmem_to_hbm [thread:$0]  (%p2190_p8), %s2838_s10, 2048, %s2836_s18, %s1371_s27, %s2035_s29, %s2035_s29, %s2036_s30  }
 0x44a   : > { %s2869_s11 = scalar_lea.vmem %s2926_s6, %s1558_s20 }
 0x48c   : > { %v1323_v40 = vpop.xlane.xlu0 %1322 }
 0x48d   : > { %1354 = vst.msk [vmem:[%s2869_s11] sm:$0xff] %vm1273_vm0, %v1323_v40 }
 0x490   : > { %v1325_v25 = vpop.xlane.xlu1 %1324 }
 0x491   : > { %1355 = vst.msk [vmem:[%s2869_s11 + $0x8] sm:$0xff] %vm1273_vm0, %v1325_v25 }
 0x494   : > { %v1327_v14 = vpop.xlane.xlu0 %1326 }
 0x495   : > { %1356 = vst.msk [vmem:[%s2869_s11 + $0x10] sm:$0xff] %vm1273_vm0, %v1327_v14 }
 0x498   : > { %v1329_v10 = vpop.xlane.xlu1 %1328 }
 0x499   : > { %1357 = vst.msk [vmem:[%s2869_s11 + $0x18] sm:$0xff] %vm1273_vm0, %v1329_v10 }
 0x49c   : > { %v1331_v47 = vpop.xlane.xlu0 %1330 }
 0x49d   : > { %1358 = vst.msk [vmem:[%s2869_s11 + $0x20] sm:$0xff] %vm1273_vm0, %v1331_v47 }
 0x4a0   : > { %v1333_v43 = vpop.xlane.xlu1 %1332 }
 0x4a1   : > { %1359 = vst.msk [vmem:[%s2869_s11 + $0x28] sm:$0xff] %vm1273_vm0, %v1333_v43 }
 0x4a4   : > { %v1335_v50 = vpop.xlane.xlu0 %1334 }
 0x4a5   : > { %1360 = vst.msk [vmem:[%s2869_s11 + $0x30] sm:$0xff] %vm1273_vm0, %v1335_v50 }
 0x4a8   : > { %v1337_v21 = vpop.xlane.xlu1 %1336 }
 0x4a9   : > { %1361 = vst.msk [vmem:[%s2869_s11 + $0x38] sm:$0xff] %vm1273_vm0, %v1337_v21 }
 0x4ac   : > { %v1339_v54 = vpop.xlane.xlu0 %1338 }
 0x4ad   : > { %1362 = vst.msk [vmem:[%s2869_s11 + $0x40] sm:$0xff] %vm1273_vm0, %v1339_v54 }
 0x4b0   : > { %v1341_v61 = vpop.xlane.xlu1 %1340 }
 0x4b1   : > { %1363 = vst.msk [vmem:[%s2869_s11 + $0x48] sm:$0xff] %vm1273_vm0, %v1341_v61 }
 0x4b4   : > { %v1343_v62 = vpop.xlane.xlu0 %1342 }
 0x4b5   : > { %1364 = vst.msk [vmem:[%s2869_s11 + $0x50] sm:$0xff] %vm1273_vm0, %v1343_v62 }
 0x4b8   : > { %v1345_v37 = vpop.xlane.xlu1 %1344 }
 0x4b9   : > { %1365 = vst.msk [vmem:[%s2869_s11 + $0x58] sm:$0xff] %vm1273_vm0, %v1345_v37 }
 0x4bc   : > { %v1347_v39 = vpop.xlane.xlu0 %1346 }
 0x4bd   : > { %1366 = vst.msk [vmem:[%s2869_s11 + $0x60] sm:$0xff] %vm1273_vm0, %v1347_v39 }
 0x4c0   : > { %v1349_v55 = vpop.xlane.xlu1 %1348 }
 0x4c1   : > { %1367 = vst.msk [vmem:[%s2869_s11 + $0x68] sm:$0xff] %vm1273_vm0, %v1349_v55 }
 0x4c4   : > { %v1351_v15 = vpop.xlane.xlu0 %1350 }
 0x4c5   : > { %1368 = vst.msk [vmem:[%s2869_s11 + $0x70] sm:$0xff] %vm1273_vm0, %v1351_v15 }
 0x4c8   : > { %v1353_v51 = vpop.xlane.xlu1 %1352 }
 0x4c9   : > { %1369 = vst.msk [vmem:[%s2869_s11 + $0x78] sm:$0xff] %vm1273_vm0, %v1353_v51 }
 0x4ca PF: > { %p1808_p8 = scmp.ge.s32.totalorder %s2023_s24, 2  ;;  %s1417_s14 = sand.u32 1, %s2011_s21  }
 0x4cb   : > { %p2941_p13 = scmp.ne.s32.totalorder %s2931_s28, 0  ;;  %s1418_s12 = scalar_lea.sflag [#allocation4], %s1417_s14 }
 0x4cd   : > { %p1800_p3 = pnand %p1808_p8, %p2941_p13 }
 0x4cf   : > { %2006 = dma.done.wait (!%p1800_p3), %s1418_s12, 2048  }
 0x4d0   : > { %2008 = vsyncadd (!%p1800_p3), %s1418_s12, 4294965248  ;;  %p21_p7 = scmp.ge.s32.totalorder %s2177_s9, 6   ;;  %s2942_s21 = smov %s2015_s22 }
 0x4d1   : > { %s2943_s22 = smov %s2019_s23  ;;  %s2944_s23 = smov %s2186_s13 }
 0x4d2   : > { %s2945_s24 = smov %s2177_s9  ;;  %23 = sbr.rel (!%p21_p7) target bundleno = 6 (0x6), region = 113 }
 0x4d9   :  { %1439 = vsyncpa [#allocation3], 1 }
 0x4da   :  { %1441 = vsyncpa [#allocation3 + $0x1], 1 }
 0x4db   :  { %1442 = vsyncpa [#allocation6], 1 }
 0x4dc   :  { %1443 = vsyncpa [#allocation4], 1 }
 0x4dd   :  { %1445 = vsyncpa [#allocation4 + $0x1], 1 }

</bundles_post_ra>
